<compile_context>
chip_gen: v5e
topology: v5e:2x2
jax: 0.10.0
libtpu: 0.0.40
codegen_flags: <defaults>
</compile_context>

<pallas_src>
import functools
import math

import jax
import jax.numpy as jnp
from jax import lax
from jax.experimental import pallas as pl
from jax.experimental.pallas import tpu as pltpu


# ----------------------------------------------------------------------------
# Tiling helpers
# ----------------------------------------------------------------------------
def _pick_lane_tile(N, pref=512):
    for t in (pref, 256, 128):
        if N % t == 0:
            return t
    return N                      # small / odd N: one full lane block


def _pick_k_tile(K, pref=1024):
    for t in (pref, 512, 256, 128):
        if K % t == 0:
            return t
    return K                      # small / odd K: keep K whole


# ----------------------------------------------------------------------------
# Pallas kernels
# ----------------------------------------------------------------------------
def _patch_embed_kernel(x_ref, w_ref, o_ref):
    """Patch embedding matmul (conv1 with stride=patch, bias=False)."""
    o_ref[...] = jnp.dot(x_ref[...].astype(jnp.bfloat16), w_ref[...],
                         preferred_element_type=jnp.float32).astype(o_ref.dtype)


def _layernorm_kernel(x_ref, g_ref, b_ref, o_ref):
    """Standalone LayerNorm (ln_pre), per-batch tile."""
    x = x_ref[0].astype(jnp.float32)
    mean = jnp.mean(x, axis=-1, keepdims=True)
    xc = x - mean
    var = jnp.mean(xc * xc, axis=-1, keepdims=True)
    inv = lax.rsqrt(var + 1e-5)
    o_ref[0] = (xc * inv * g_ref[...] + b_ref[...]).astype(o_ref.dtype)


def _ln_matmul_kernel(x_ref, g_ref, b_ref, w_ref, bias_ref, o_ref, h_ref, *,
                      activation):
    """Fused LayerNorm prologue + matmul + bias (+QuickGELU).

    Grid = (B, N//tn). The LayerNormed tile is computed once per batch block
    (j == 0) into the VMEM scratch `h_ref` (bf16) and reused for all output
    column tiles j > 0.
    """
    j = pl.program_id(1)

    @pl.when(j == 0)
    def _():
        x = x_ref[0].astype(jnp.float32)
        mean = jnp.mean(x, axis=-1, keepdims=True)
        xc = x - mean
        var = jnp.mean(xc * xc, axis=-1, keepdims=True)
        inv = lax.rsqrt(var + 1e-5)
        h_ref[...] = (xc * inv * g_ref[...] + b_ref[...]).astype(h_ref.dtype)

    acc = jnp.dot(h_ref[...], w_ref[...], preferred_element_type=jnp.float32)
    acc = acc + bias_ref[...]
    if activation == "quick_gelu":
        acc = acc * jax.nn.sigmoid(1.702 * acc)      # CLIP QuickGELU
    o_ref[0] = acc.astype(o_ref.dtype)


def _matmul_residual_kernel(a_ref, w_ref, bias_ref, res_ref, o_ref, acc_ref):
    """K-accumulating tiled matmul with fused bias + residual add epilogue.

    Grid = (B, N//tn, K//tk), f32 VMEM accumulator, single writeback on the
    last K step.
    """
    k = pl.program_id(2)

    @pl.when(k == 0)
    def _():
        acc_ref[...] = jnp.zeros_like(acc_ref)

    acc_ref[...] += jnp.dot(a_ref[0], w_ref[...],
                            preferred_element_type=jnp.float32)

    @pl.when(k == pl.num_programs(2) - 1)
    def _():
        acc = acc_ref[...] + bias_ref[...] + res_ref[0].astype(jnp.float32)
        o_ref[0] = acc.astype(o_ref.dtype)


def _attention_kernel(qkv_ref, o_ref, *, heads, head_dim, scale):
    """Per-batch multi-head attention.

    qkv tile: (1, S, 3*width) laid out as [q | k | v]. q/k/v are sliced per
    head straight from the ref (no whole-tile materialization) and each head's
    output is stored directly into its lane slice of o_ref (no concat).
    """
    width = heads * head_dim
    for h in range(heads):                                    # static unroll
        lo = h * head_dim
        q = qkv_ref[0, :, lo:lo + head_dim]
        k = qkv_ref[0, :, width + lo:width + lo + head_dim]
        v = qkv_ref[0, :, 2 * width + lo:2 * width + lo + head_dim]
        s = lax.dot_general(q, k, (((1,), (1,)), ((), ())),
                            preferred_element_type=jnp.float32) * scale
        s = s - jnp.max(s, axis=-1, keepdims=True)
        p = jnp.exp(s)
        p = p * pl.reciprocal(jnp.sum(p, axis=-1, keepdims=True), approx=True)
        out_h = jnp.dot(p.astype(v.dtype), v,
                        preferred_element_type=jnp.float32)
        o_ref[0, :, lo:lo + head_dim] = out_h.astype(o_ref.dtype)


def _similarity_kernel(img_ref, txt_ref, o_ref):
    """Normalize image features (f32) and matmul against a text-column tile."""
    img = img_ref[...].astype(jnp.float32)
    inv = lax.rsqrt(jnp.sum(img * img, axis=-1, keepdims=True))
    img_n = (img * inv).astype(txt_ref.dtype)
    o_ref[...] = jnp.dot(img_n, txt_ref[...],
                         preferred_element_type=jnp.float32)


# ----------------------------------------------------------------------------
# pallas_call wrappers (no per-call casts / pads — params come kernel-ready)
# ----------------------------------------------------------------------------
def pallas_patch_embed(xp, w, out_dtype=jnp.bfloat16):
    """xp:(M, C*p*p) f32, w:(C*p*p, width) bf16 -> (M, width) bf16."""
    M, K = xp.shape
    _, N = w.shape
    tn = _pick_lane_tile(N)
    return pl.pallas_call(
        _patch_embed_kernel,
        out_shape=jax.ShapeDtypeStruct((M, N), out_dtype),
        grid=(N // tn,),
        in_specs=[
            pl.BlockSpec((M, K), lambda j: (0, 0)),
            pl.BlockSpec((K, tn), lambda j: (0, j)),
        ],
        out_specs=pl.BlockSpec((M, tn), lambda j: (0, j)),
        compiler_params=pltpu.CompilerParams(dimension_semantics=("parallel",)),
    )(xp, w)


def pallas_layernorm(x, gamma, beta, out_dtype=jnp.bfloat16):
    """x:(B, S, D) -> LayerNorm(x), tiled per batch."""
    B, S, D = x.shape
    return pl.pallas_call(
        _layernorm_kernel,
        out_shape=jax.ShapeDtypeStruct((B, S, D), out_dtype),
        grid=(B,),
        in_specs=[
            pl.BlockSpec((1, S, D), lambda b: (b, 0, 0)),
            pl.BlockSpec((1, D), lambda b: (0, 0)),
            pl.BlockSpec((1, D), lambda b: (0, 0)),
        ],
        out_specs=pl.BlockSpec((1, S, D), lambda b: (b, 0, 0)),
        compiler_params=pltpu.CompilerParams(dimension_semantics=("parallel",)),
    )(x, gamma, beta)


def pallas_ln_matmul(x, gamma, beta, w, bias, activation=None,
                     out_dtype=jnp.bfloat16):
    """out = act(LayerNorm(x) @ W + bias). x:(B, S, K) bf16, W:(K, N) bf16."""
    B, S, K = x.shape
    _, N = w.shape
    tn = _pick_lane_tile(N)
    return pl.pallas_call(
        functools.partial(_ln_matmul_kernel, activation=activation),
        out_shape=jax.ShapeDtypeStruct((B, S, N), out_dtype),
        grid=(B, N // tn),
        in_specs=[
            pl.BlockSpec((1, S, K), lambda b, j: (b, 0, 0)),   # resident over j
            pl.BlockSpec((1, K), lambda b, j: (0, 0)),
            pl.BlockSpec((1, K), lambda b, j: (0, 0)),
            pl.BlockSpec((K, tn), lambda b, j: (0, j)),
            pl.BlockSpec((1, tn), lambda b, j: (0, j)),
        ],
        out_specs=pl.BlockSpec((1, S, tn), lambda b, j: (b, 0, j)),
        scratch_shapes=[pltpu.VMEM((S, K), jnp.bfloat16)],     # cached LN tile
        compiler_params=pltpu.CompilerParams(
            dimension_semantics=("parallel", "arbitrary")),
    )(x, gamma, beta, w, bias)


def pallas_matmul_residual(a, w, bias, residual, out_dtype=jnp.bfloat16):
    """out = A @ W + bias + residual. A:(B, S, K) bf16, W:(K, N) bf16."""
    B, S, K = a.shape
    _, N = w.shape
    tn = _pick_lane_tile(N)
    tk = _pick_k_tile(K)
    return pl.pallas_call(
        _matmul_residual_kernel,
        out_shape=jax.ShapeDtypeStruct((B, S, N), out_dtype),
        grid=(B, N // tn, K // tk),
        in_specs=[
            pl.BlockSpec((1, S, tk), lambda b, j, k: (b, 0, k)),
            pl.BlockSpec((tk, tn), lambda b, j, k: (k, j)),
            pl.BlockSpec((1, tn), lambda b, j, k: (0, j)),
            pl.BlockSpec((1, S, tn), lambda b, j, k: (b, 0, j)),
        ],
        out_specs=pl.BlockSpec((1, S, tn), lambda b, j, k: (b, 0, j)),
        scratch_shapes=[pltpu.VMEM((S, tn), jnp.float32)],
        compiler_params=pltpu.CompilerParams(
            dimension_semantics=("parallel", "parallel", "arbitrary")),
    )(a, w, bias, residual)


def pallas_attention(qkv, heads):
    """Multi-head self-attention. qkv:(B, S, 3*width) bf16 -> (B, S, width)."""
    B, S, threew = qkv.shape
    width = threew // 3
    head_dim = width // heads
    scale = 1.0 / math.sqrt(head_dim)
    # TODO(synk): v7x-specific (B, heads) gridding / 128-lane head packing not
    # applied; per-head slices are static so the unrolled body stays small.
    return pl.pallas_call(
        functools.partial(_attention_kernel, heads=heads, head_dim=head_dim,
                          scale=scale),
        out_shape=jax.ShapeDtypeStruct((B, S, width), qkv.dtype),
        grid=(B,),
        in_specs=[pl.BlockSpec((1, S, threew), lambda b: (b, 0, 0))],
        out_specs=pl.BlockSpec((1, S, width), lambda b: (b, 0, 0)),
        compiler_params=pltpu.CompilerParams(dimension_semantics=("parallel",)),
    )(qkv)


def pallas_norm_similarity(image_features, text_features_t):
    """scores = (img / ||img||) @ text_t, tiled over the text axis. f32 out."""
    B, E = image_features.shape
    _, T = text_features_t.shape
    tn = _pick_lane_tile(T)
    return pl.pallas_call(
        _similarity_kernel,
        out_shape=jax.ShapeDtypeStruct((B, T), jnp.float32),
        grid=(T // tn,),
        in_specs=[
            pl.BlockSpec((B, E), lambda j: (0, 0)),
            pl.BlockSpec((E, tn), lambda j: (0, j)),
        ],
        out_specs=pl.BlockSpec((B, tn), lambda j: (0, j)),
        compiler_params=pltpu.CompilerParams(dimension_semantics=("parallel",)),
    )(image_features.astype(jnp.float32), text_features_t)


# ----------------------------------------------------------------------------
# Parameter init (deterministic, synthetic, kernel-ready dtypes/shapes)
# ----------------------------------------------------------------------------
def init_params(key, *, in_ch, patch, width, layers, heads, embed_dim,
                num_patches, num_texts):
    def nrm(k, shape, scale=0.02):
        return scale * jax.random.normal(k, shape, dtype=jnp.float32)

    keys = iter(jax.random.split(key, 8 + layers * 8))
    params = {
        # conv1 (patch embed) as matmul weight (C*p*p, width), bias=False
        "conv1_w": nrm(next(keys), (in_ch * patch * patch, width)).astype(jnp.bfloat16),
        "class_embedding": nrm(next(keys), (width,)),
        "positional_embedding": nrm(next(keys), (num_patches + 1, width)),
        "ln_pre_g": jnp.ones((1, width), jnp.float32),
        "ln_pre_b": jnp.zeros((1, width), jnp.float32),
        "ln_post_g": jnp.ones((1, width), jnp.float32),
        "ln_post_b": jnp.zeros((1, width), jnp.float32),
        "visual_proj_w": nrm(next(keys), (width, embed_dim)).astype(jnp.bfloat16),
        "visual_proj_b": jnp.zeros((1, embed_dim), jnp.float32),  # CLIP proj has no bias
        "blocks": [],
    }
    for _ in range(layers):
        blk = {
            "ln1_g": jnp.ones((1, width), jnp.float32),
            "ln1_b": jnp.zeros((1, width), jnp.float32),
            "in_proj_w": nrm(next(keys), (width, 3 * width)).astype(jnp.bfloat16),
            "in_proj_b": nrm(next(keys), (1, 3 * width)),
            "out_proj_w": nrm(next(keys), (width, width)).astype(jnp.bfloat16),
            "out_proj_b": nrm(next(keys), (1, width)),
            "ln2_g": jnp.ones((1, width), jnp.float32),
            "ln2_b": jnp.zeros((1, width), jnp.float32),
            "fc_w": nrm(next(keys), (width, 4 * width)).astype(jnp.bfloat16),
            "fc_b": nrm(next(keys), (1, 4 * width)),
            "proj_w": nrm(next(keys), (4 * width, width)).astype(jnp.bfloat16),
            "proj_b": nrm(next(keys), (1, width)),
        }
        params["blocks"].append(blk)

    # equip_semantic_modal equivalent: pre-normalized text features stored
    # transposed (embed_dim, num_texts) in bf16 for a lane-dense similarity matmul.
    tf = jax.random.normal(next(keys), (num_texts, embed_dim), dtype=jnp.float32)
    tf = tf / jnp.linalg.norm(tf, axis=-1, keepdims=True)
    params["text_features_t"] = tf.T.astype(jnp.bfloat16)
    return params


# ----------------------------------------------------------------------------
# Forward pass
# ----------------------------------------------------------------------------
def encode_image(params, x, *, patch, width, heads, layers):
    B, C, H, W = x.shape
    gh, gw = H // patch, W // patch
    # Patchify (stride-p conv1 with bias=False): each patch flattened as (C, ph, pw)
    xp = x.reshape(B, C, gh, patch, gw, patch)
    xp = jnp.transpose(xp, (0, 2, 4, 1, 3, 5)).reshape(B * gh * gw, C * patch * patch)
    x_emb = pallas_patch_embed(xp, params["conv1_w"])            # (B*G, width) bf16
    x_emb = x_emb.reshape(B, gh * gw, width)

    cls = jnp.broadcast_to(
        params["class_embedding"].reshape(1, 1, width).astype(jnp.bfloat16),
        (B, 1, width))
    x_seq = jnp.concatenate([cls, x_emb], axis=1)                # (B, S, width)
    x_seq = (x_seq.astype(jnp.float32)
             + params["positional_embedding"][None]).astype(jnp.bfloat16)

    # Residual stream stays 3-D (B, S, width) in bf16; no per-call padding.
    h = pallas_layernorm(x_seq, params["ln_pre_g"], params["ln_pre_b"])

    for l in range(layers):
        p = params["blocks"][l]
        # --- attention branch: x = x + out_proj(attn(ln_1(x))) ---
        qkv = pallas_ln_matmul(h, p["ln1_g"], p["ln1_b"],
                               p["in_proj_w"], p["in_proj_b"])   # (B, S, 3W)
        attn = pallas_attention(qkv, heads)                      # (B, S, W)
        h = pallas_matmul_residual(attn, p["out_proj_w"], p["out_proj_b"], h)
        # --- MLP branch: x = x + proj(QuickGELU(fc(ln_2(x)))) ---
        fc = pallas_ln_matmul(h, p["ln2_g"], p["ln2_b"],
                              p["fc_w"], p["fc_b"], activation="quick_gelu")
        h = pallas_matmul_residual(fc, p["proj_w"], p["proj_b"], h)

    cls_out = h[:, 0:1, :]                                       # (B, 1, width)
    # ln_post fused into the visual projection matmul
    image_features = pallas_ln_matmul(cls_out, params["ln_post_g"],
                                      params["ln_post_b"],
                                      params["visual_proj_w"],
                                      params["visual_proj_b"],
                                      out_dtype=jnp.float32)     # (B, 1, E)
    return image_features.reshape(B, -1)


def clip_model_super_forward(params, vision_inputs, *, patch, width, heads, layers):
    image_features = encode_image(params, vision_inputs, patch=patch,
                                  width=width, heads=heads, layers=layers)
    scores = pallas_norm_similarity(image_features, params["text_features_t"])
    return scores  # float32, matching scores.float()


# ----------------------------------------------------------------------------
if __name__ == "__main__":
    # Small, CLIP-ViT-shaped config
    B, C, H, W = 2, 3, 16, 16
    PATCH = 8
    WIDTH = 32
    HEADS = 4
    LAYERS = 2
    EMBED_DIM = 16
    NUM_TEXTS = 8
    NUM_PATCHES = (H // PATCH) * (W // PATCH)

    root = jax.random.PRNGKey(0)
    k_params, k_input = jax.random.split(root)
    params = init_params(k_params, in_ch=C, patch=PATCH, width=WIDTH,
                         layers=LAYERS, heads=HEADS, embed_dim=EMBED_DIM,
                         num_patches=NUM_PATCHES, num_texts=NUM_TEXTS)
    vision_inputs = jax.random.normal(k_input, (B, C, H, W), dtype=jnp.float32)

    fwd = jax.jit(functools.partial(clip_model_super_forward, patch=PATCH,
                                    width=WIDTH, heads=HEADS, layers=LAYERS))
    scores = jax.block_until_ready(fwd(params, vision_inputs))
    assert scores.shape == (B, NUM_TEXTS) and scores.dtype == jnp.float32
    assert bool(jnp.all(jnp.isfinite(scores)))
    # TODO(synk): clip.load / clip.tokenize (checkpoint + text tokenizer/encoder)
    # have no Pallas equivalent; weights and normalized text features are
    # synthesized deterministically instead.
    print("KERNEL_OK")
</pallas_src>

<mosaic_0001>
module attributes {stable_mosaic.version = 11 : i64} {
  func.func @_patch_embed_kernel(%arg0: i32, %arg1: memref<8x192xf32, #tpu.memory_space<vmem>>, %arg2: memref<192x32xbf16, #tpu.memory_space<vmem>>, %arg3: memref<8x32xbf16, #tpu.memory_space<vmem>>) attributes {dimension_semantics = [#tpu.dimension_semantics<parallel>], iteration_bounds = array<i64: 1>, scalar_prefetch = 0 : i64, scratch_operands = 0 : i64, tpu.core_type = #tpu.core_type<tc>, window_params = [{pipeline_mode = #tpu.pipeline_mode<synchronous>, transform_indices = @transform_0, window_bounds = array<i64: 8, 192>}, {transform_indices = @transform_1, window_bounds = array<i64: 192, 32>}, {transform_indices = @transform_2, window_bounds = array<i64: 8, 32>}]} {
    %c0 = arith.constant 0 : index
    %c0_0 = arith.constant 0 : index
    %0 = vector.load %arg1[%c0, %c0_0] : memref<8x192xf32, #tpu.memory_space<vmem>>, vector<8x192xf32>
    %1 = arith.truncf %0 : vector<8x192xf32> to vector<8x192xbf16>
    %c0_1 = arith.constant 0 : index
    %c0_2 = arith.constant 0 : index
    %2 = vector.load %arg2[%c0_1, %c0_2] : memref<192x32xbf16, #tpu.memory_space<vmem>>, vector<192x32xbf16>
    %cst = arith.constant dense<0.000000e+00> : vector<8x32xf32>
    %3 = tpu.matmul %1, %2, %cst {dimension_numbers = #tpu.dot_dimension_numbers<[1], [0], [0], [1], [0, 0, 1, 1], [], []>} : vector<8x192xbf16>, vector<192x32xbf16>, vector<8x32xf32> -> vector<8x32xf32>
    %4 = arith.truncf %3 : vector<8x32xf32> to vector<8x32xbf16>
    %c0_3 = arith.constant 0 : index
    %c0_4 = arith.constant 0 : index
    %5 = vector.load %arg3[%c0_3, %c0_4] : memref<8x32xbf16, #tpu.memory_space<vmem>>, vector<8x32xbf16>
    tpu.vector_store %arg3[%c0_3, %c0_4], %4 {strides = array<i32>} : memref<8x32xbf16, #tpu.memory_space<vmem>>, vector<8x32xbf16>,
    return
  }
  func.func @transform_0(%arg0: i32) -> (i32, i32) {
    %c0_i32 = arith.constant 0 : i32
    %c0_i32_0 = arith.constant 0 : i32
    %c0_i32_1 = arith.constant 0 : i32
    return %c0_i32, %c0_i32_0 : i32, i32
  }
  func.func @transform_1(%arg0: i32) -> (i32, i32) {
    %c0_i32 = arith.constant 0 : i32
    %c0_i32_0 = arith.constant 0 : i32
    return %c0_i32, %arg0 : i32, i32
  }
  func.func @transform_2(%arg0: i32) -> (i32, i32) {
    %c0_i32 = arith.constant 0 : i32
    %c0_i32_0 = arith.constant 0 : i32
    return %c0_i32, %arg0 : i32, i32
  }
}

module attributes {stable_mosaic.version = 11 : i64} {
  func.func @_layernorm_kernel(%arg0: i32, %arg1: memref<1x5x32xbf16, #tpu.memory_space<vmem>>, %arg2: memref<1x32xf32, #tpu.memory_space<vmem>>, %arg3: memref<1x32xf32, #tpu.memory_space<vmem>>, %arg4: memref<1x5x32xbf16, #tpu.memory_space<vmem>>) attributes {dimension_semantics = [#tpu.dimension_semantics<parallel>], iteration_bounds = array<i64: 2>, scalar_prefetch = 0 : i64, scratch_operands = 0 : i64, tpu.core_type = #tpu.core_type<tc>, window_params = [{transform_indices = @transform_0, window_bounds = array<i64: 1, 5, 32>}, {pipeline_mode = #tpu.pipeline_mode<synchronous>, transform_indices = @transform_1, window_bounds = array<i64: 1, 32>}, {pipeline_mode = #tpu.pipeline_mode<synchronous>, transform_indices = @transform_2, window_bounds = array<i64: 1, 32>}, {transform_indices = @transform_3, window_bounds = array<i64: 1, 5, 32>}]} {
    %c0 = arith.constant 0 : index
    %c0_0 = arith.constant 0 : index
    %c0_1 = arith.constant 0 : index
    %0 = vector.load %arg1[%c0, %c0_0, %c0_1] : memref<1x5x32xbf16, #tpu.memory_space<vmem>>, vector<1x5x32xbf16>
    %1 = vector.shape_cast %0 : vector<1x5x32xbf16> to vector<5x32xbf16>
    %2 = arith.extf %1 : vector<5x32xbf16> to vector<5x32xf32>
    %cst = arith.constant dense<0.000000e+00> : vector<5xf32>
    %3 = vector.multi_reduction <add>, %2, %cst [1] : vector<5x32xf32> to vector<5xf32>
    %4 = vector.shape_cast %3 : vector<5xf32> to vector<5x1xf32>
    %cst_2 = arith.constant 3.200000e+01 : f32
    %5 = vector.broadcast %cst_2 : f32 to vector<5x1xf32>
    %6 = arith.divf %4, %5 : vector<5x1xf32>
    %7 = vector.broadcast %6 : vector<5x1xf32> to vector<5x32xf32>
    %8 = arith.subf %2, %7 : vector<5x32xf32>
    %9 = arith.mulf %8, %8 : vector<5x32xf32>
    %cst_3 = arith.constant dense<0.000000e+00> : vector<5xf32>
    %10 = vector.multi_reduction <add>, %9, %cst_3 [1] : vector<5x32xf32> to vector<5xf32>
    %11 = vector.shape_cast %10 : vector<5xf32> to vector<5x1xf32>
    %cst_4 = arith.constant 3.200000e+01 : f32
    %12 = vector.broadcast %cst_4 : f32 to vector<5x1xf32>
    %13 = arith.divf %11, %12 : vector<5x1xf32>
    %cst_5 = arith.constant 9.99999974E-6 : f32
    %14 = vector.broadcast %cst_5 : f32 to vector<5x1xf32>
    %15 = arith.addf %13, %14 : vector<5x1xf32>
    %16 = math.rsqrt %15 : vector<5x1xf32>
    %17 = vector.broadcast %16 : vector<5x1xf32> to vector<5x32xf32>
    %18 = arith.mulf %8, %17 : vector<5x32xf32>
    %c0_6 = arith.constant 0 : index
    %c0_7 = arith.constant 0 : index
    %19 = vector.load %arg2[%c0_6, %c0_7] : memref<1x32xf32, #tpu.memory_space<vmem>>, vector<1x32xf32>
    %20 = vector.broadcast %19 : vector<1x32xf32> to vector<5x32xf32>
    %21 = arith.mulf %18, %20 : vector<5x32xf32>
    %c0_8 = arith.constant 0 : index
    %c0_9 = arith.constant 0 : index
    %22 = vector.load %arg3[%c0_8, %c0_9] : memref<1x32xf32, #tpu.memory_space<vmem>>, vector<1x32xf32>
    %23 = vector.broadcast %22 : vector<1x32xf32> to vector<5x32xf32>
    %24 = arith.addf %21, %23 : vector<5x32xf32>
    %25 = arith.truncf %24 : vector<5x32xf32> to vector<5x32xbf16>
    %c0_10 = arith.constant 0 : index
    %c0_11 = arith.constant 0 : index
    %c0_12 = arith.constant 0 : index
    %26 = vector.load %arg4[%c0_10, %c0_11, %c0_12] : memref<1x5x32xbf16, #tpu.memory_space<vmem>>, vector<1x5x32xbf16>
    %27 = vector.shape_cast %26 : vector<1x5x32xbf16> to vector<5x32xbf16>
    %28 = vector.shape_cast %25 : vector<5x32xbf16> to vector<1x5x32xbf16>
    tpu.vector_store %arg4[%c0_10, %c0_11, %c0_12], %28 {strides = array<i32>} : memref<1x5x32xbf16, #tpu.memory_space<vmem>>, vector<1x5x32xbf16>,
    return
  }
  func.func @transform_0(%arg0: i32) -> (i32, i32, i32) {
    %c0_i32 = arith.constant 0 : i32
    %c0_i32_0 = arith.constant 0 : i32
    %c0_i32_1 = arith.constant 0 : i32
    return %arg0, %c0_i32, %c0_i32_0 : i32, i32, i32
  }
  func.func @transform_1(%arg0: i32) -> (i32, i32) {
    %c0_i32 = arith.constant 0 : i32
    %c0_i32_0 = arith.constant 0 : i32
    %c0_i32_1 = arith.constant 0 : i32
    return %c0_i32, %c0_i32_0 : i32, i32
  }
  func.func @transform_2(%arg0: i32) -> (i32, i32) {
    %c0_i32 = arith.constant 0 : i32
    %c0_i32_0 = arith.constant 0 : i32
    %c0_i32_1 = arith.constant 0 : i32
    return %c0_i32, %c0_i32_0 : i32, i32
  }
  func.func @transform_3(%arg0: i32) -> (i32, i32, i32) {
    %c0_i32 = arith.constant 0 : i32
    %c0_i32_0 = arith.constant 0 : i32
    %c0_i32_1 = arith.constant 0 : i32
    return %arg0, %c0_i32, %c0_i32_0 : i32, i32, i32
  }
}

module attributes {stable_mosaic.version = 11 : i64} {
  func.func @_attention_kernel(%arg0: i32, %arg1: memref<1x5x96xbf16, #tpu.memory_space<vmem>>, %arg2: memref<1x5x32xbf16, #tpu.memory_space<vmem>>) attributes {dimension_semantics = [#tpu.dimension_semantics<parallel>], iteration_bounds = array<i64: 2>, scalar_prefetch = 0 : i64, scratch_operands = 0 : i64, tpu.core_type = #tpu.core_type<tc>, window_params = [{transform_indices = @transform_0, window_bounds = array<i64: 1, 5, 96>}, {transform_indices = @transform_1, window_bounds = array<i64: 1, 5, 32>}]} {
    %c0 = arith.constant 0 : index
    %c0_0 = arith.constant 0 : index
    %c0_1 = arith.constant 0 : index
    %0 = vector.load %arg1[%c0, %c0_0, %c0_1] : memref<1x5x96xbf16, #tpu.memory_space<vmem>>, vector<1x5x8xbf16>
    %1 = vector.shape_cast %0 : vector<1x5x8xbf16> to vector<5x8xbf16>
    %c0_2 = arith.constant 0 : index
    %c0_3 = arith.constant 0 : index
    %c32 = arith.constant 32 : index
    %2 = vector.load %arg1[%c0_2, %c0_3, %c32] : memref<1x5x96xbf16, #tpu.memory_space<vmem>>, vector<1x5x8xbf16>
    %3 = vector.shape_cast %2 : vector<1x5x8xbf16> to vector<5x8xbf16>
    %c0_4 = arith.constant 0 : index
    %c0_5 = arith.constant 0 : index
    %c64 = arith.constant 64 : index
    %4 = vector.load %arg1[%c0_4, %c0_5, %c64] : memref<1x5x96xbf16, #tpu.memory_space<vmem>>, vector<1x5x8xbf16>
    %5 = vector.shape_cast %4 : vector<1x5x8xbf16> to vector<5x8xbf16>
    %cst = arith.constant dense<0.000000e+00> : vector<5x5xf32>
    %6 = tpu.matmul %1, %3, %cst {dimension_numbers = #tpu.dot_dimension_numbers<[1], [1], [0], [0], [0, 0, 1, 0], [], []>} : vector<5x8xbf16>, vector<5x8xbf16>, vector<5x5xf32> -> vector<5x5xf32>
    %cst_6 = arith.constant 0.353553385 : f32
    %7 = vector.broadcast %cst_6 : f32 to vector<5x5xf32>
    %8 = arith.mulf %6, %7 : vector<5x5xf32>
    %cst_7 = arith.constant dense<0xFF800000> : vector<5xf32>
    %9 = vector.multi_reduction <maximumf>, %8, %cst_7 [1] : vector<5x5xf32> to vector<5xf32>
    %10 = vector.shape_cast %9 : vector<5xf32> to vector<5x1xf32>
    %11 = vector.broadcast %10 : vector<5x1xf32> to vector<5x5xf32>
    %12 = arith.subf %8, %11 : vector<5x5xf32>
    %13 = math.exp %12 : vector<5x5xf32>
    %cst_8 = arith.constant dense<0.000000e+00> : vector<5xf32>
    %14 = vector.multi_reduction <add>, %13, %cst_8 [1] : vector<5x5xf32> to vector<5xf32>
    %15 = vector.shape_cast %14 : vector<5xf32> to vector<5x1xf32>
    %16 = tpu.reciprocal %15 {approx = true} : vector<5x1xf32> -> vector<5x1xf32>
    %17 = vector.broadcast %16 : vector<5x1xf32> to vector<5x5xf32>
    %18 = arith.mulf %13, %17 : vector<5x5xf32>
    %19 = arith.truncf %18 : vector<5x5xf32> to vector<5x5xbf16>
    %cst_9 = arith.constant dense<0.000000e+00> : vector<5x8xf32>
    %20 = tpu.matmul %19, %5, %cst_9 {dimension_numbers = #tpu.dot_dimension_numbers<[1], [0], [0], [1], [0, 0, 1, 1], [], []>} : vector<5x5xbf16>, vector<5x8xbf16>, vector<5x8xf32> -> vector<5x8xf32>
    %21 = arith.truncf %20 : vector<5x8xf32> to vector<5x8xbf16>
    %c0_10 = arith.constant 0 : index
    %c0_11 = arith.constant 0 : index
    %c0_12 = arith.constant 0 : index
    %22 = vector.load %arg2[%c0_10, %c0_11, %c0_12] : memref<1x5x32xbf16, #tpu.memory_space<vmem>>, vector<1x5x8xbf16>
    %23 = vector.shape_cast %22 : vector<1x5x8xbf16> to vector<5x8xbf16>
    %24 = vector.shape_cast %21 : vector<5x8xbf16> to vector<1x5x8xbf16>
    tpu.vector_store %arg2[%c0_10, %c0_11, %c0_12], %24 {strides = array<i32>} : memref<1x5x32xbf16, #tpu.memory_space<vmem>>, vector<1x5x8xbf16>,
    %c0_13 = arith.constant 0 : index
    %c0_14 = arith.constant 0 : index
    %c8 = arith.constant 8 : index
    %25 = vector.load %arg1[%c0_13, %c0_14, %c8] : memref<1x5x96xbf16, #tpu.memory_space<vmem>>, vector<1x5x8xbf16>
    %26 = vector.shape_cast %25 : vector<1x5x8xbf16> to vector<5x8xbf16>
    %c0_15 = arith.constant 0 : index
    %c0_16 = arith.constant 0 : index
    %c40 = arith.constant 40 : index
    %27 = vector.load %arg1[%c0_15, %c0_16, %c40] : memref<1x5x96xbf16, #tpu.memory_space<vmem>>, vector<1x5x8xbf16>
    %28 = vector.shape_cast %27 : vector<1x5x8xbf16> to vector<5x8xbf16>
    %c0_17 = arith.constant 0 : index
    %c0_18 = arith.constant 0 : index
    %c72 = arith.constant 72 : index
    %29 = vector.load %arg1[%c0_17, %c0_18, %c72] : memref<1x5x96xbf16, #tpu.memory_space<vmem>>, vector<1x5x8xbf16>
    %30 = vector.shape_cast %29 : vector<1x5x8xbf16> to vector<5x8xbf16>
    %cst_19 = arith.constant dense<0.000000e+00> : vector<5x5xf32>
    %31 = tpu.matmul %26, %28, %cst_19 {dimension_numbers = #tpu.dot_dimension_numbers<[1], [1], [0], [0], [0, 0, 1, 0], [], []>} : vector<5x8xbf16>, vector<5x8xbf16>, vector<5x5xf32> -> vector<5x5xf32>
    %cst_20 = arith.constant 0.353553385 : f32
    %32 = vector.broadcast %cst_20 : f32 to vector<5x5xf32>
    %33 = arith.mulf %31, %32 : vector<5x5xf32>
    %cst_21 = arith.constant dense<0xFF800000> : vector<5xf32>
    %34 = vector.multi_reduction <maximumf>, %33, %cst_21 [1] : vector<5x5xf32> to vector<5xf32>
    %35 = vector.shape_cast %34 : vector<5xf32> to vector<5x1xf32>
    %36 = vector.broadcast %35 : vector<5x1xf32> to vector<5x5xf32>
    %37 = arith.subf %33, %36 : vector<5x5xf32>
    %38 = math.exp %37 : vector<5x5xf32>
    %cst_22 = arith.constant dense<0.000000e+00> : vector<5xf32>
    %39 = vector.multi_reduction <add>, %38, %cst_22 [1] : vector<5x5xf32> to vector<5xf32>
    %40 = vector.shape_cast %39 : vector<5xf32> to vector<5x1xf32>
    %41 = tpu.reciprocal %40 {approx = true} : vector<5x1xf32> -> vector<5x1xf32>
    %42 = vector.broadcast %41 : vector<5x1xf32> to vector<5x5xf32>
    %43 = arith.mulf %38, %42 : vector<5x5xf32>
    %44 = arith.truncf %43 : vector<5x5xf32> to vector<5x5xbf16>
    %cst_23 = arith.constant dense<0.000000e+00> : vector<5x8xf32>
    %45 = tpu.matmul %44, %30, %cst_23 {dimension_numbers = #tpu.dot_dimension_numbers<[1], [0], [0], [1], [0, 0, 1, 1], [], []>} : vector<5x5xbf16>, vector<5x8xbf16>, vector<5x8xf32> -> vector<5x8xf32>
    %46 = arith.truncf %45 : vector<5x8xf32> to vector<5x8xbf16>
    %c0_24 = arith.constant 0 : index
    %c0_25 = arith.constant 0 : index
    %c8_26 = arith.constant 8 : index
    %47 = vector.load %arg2[%c0_24, %c0_25, %c8_26] : memref<1x5x32xbf16, #tpu.memory_space<vmem>>, vector<1x5x8xbf16>
    %48 = vector.shape_cast %47 : vector<1x5x8xbf16> to vector<5x8xbf16>
    %49 = vector.shape_cast %46 : vector<5x8xbf16> to vector<1x5x8xbf16>
    tpu.vector_store %arg2[%c0_24, %c0_25, %c8_26], %49 {strides = array<i32>} : memref<1x5x32xbf16, #tpu.memory_space<vmem>>, vector<1x5x8xbf16>,
    %c0_27 = arith.constant 0 : index
    %c0_28 = arith.constant 0 : index
    %c16 = arith.constant 16 : index
    %50 = vector.load %arg1[%c0_27, %c0_28, %c16] : memref<1x5x96xbf16, #tpu.memory_space<vmem>>, vector<1x5x8xbf16>
    %51 = vector.shape_cast %50 : vector<1x5x8xbf16> to vector<5x8xbf16>
    %c0_29 = arith.constant 0 : index
    %c0_30 = arith.constant 0 : index
    %c48 = arith.constant 48 : index
    %52 = vector.load %arg1[%c0_29, %c0_30, %c48] : memref<1x5x96xbf16, #tpu.memory_space<vmem>>, vector<1x5x8xbf16>
    %53 = vector.shape_cast %52 : vector<1x5x8xbf16> to vector<5x8xbf16>
    %c0_31 = arith.constant 0 : index
    %c0_32 = arith.constant 0 : index
    %c80 = arith.constant 80 : index
    %54 = vector.load %arg1[%c0_31, %c0_32, %c80] : memref<1x5x96xbf16, #tpu.memory_space<vmem>>, vector<1x5x8xbf16>
    %55 = vector.shape_cast %54 : vector<1x5x8xbf16> to vector<5x8xbf16>
    %cst_33 = arith.constant dense<0.000000e+00> : vector<5x5xf32>
    %56 = tpu.matmul %51, %53, %cst_33 {dimension_numbers = #tpu.dot_dimension_numbers<[1], [1], [0], [0], [0, 0, 1, 0], [], []>} : vector<5x8xbf16>, vector<5x8xbf16>, vector<5x5xf32> -> vector<5x5xf32>
    %cst_34 = arith.constant 0.353553385 : f32
    %57 = vector.broadcast %cst_34 : f32 to vector<5x5xf32>
    %58 = arith.mulf %56, %57 : vector<5x5xf32>
    %cst_35 = arith.constant dense<0xFF800000> : vector<5xf32>
    %59 = vector.multi_reduction <maximumf>, %58, %cst_35 [1] : vector<5x5xf32> to vector<5xf32>
    %60 = vector.shape_cast %59 : vector<5xf32> to vector<5x1xf32>
    %61 = vector.broadcast %60 : vector<5x1xf32> to vector<5x5xf32>
    %62 = arith.subf %58, %61 : vector<5x5xf32>
    %63 = math.exp %62 : vector<5x5xf32>
    %cst_36 = arith.constant dense<0.000000e+00> : vector<5xf32>
    %64 = vector.multi_reduction <add>, %63, %cst_36 [1] : vector<5x5xf32> to vector<5xf32>
    %65 = vector.shape_cast %64 : vector<5xf32> to vector<5x1xf32>
    %66 = tpu.reciprocal %65 {approx = true} : vector<5x1xf32> -> vector<5x1xf32>
    %67 = vector.broadcast %66 : vector<5x1xf32> to vector<5x5xf32>
    %68 = arith.mulf %63, %67 : vector<5x5xf32>
    %69 = arith.truncf %68 : vector<5x5xf32> to vector<5x5xbf16>
    %cst_37 = arith.constant dense<0.000000e+00> : vector<5x8xf32>
    %70 = tpu.matmul %69, %55, %cst_37 {dimension_numbers = #tpu.dot_dimension_numbers<[1], [0], [0], [1], [0, 0, 1, 1], [], []>} : vector<5x5xbf16>, vector<5x8xbf16>, vector<5x8xf32> -> vector<5x8xf32>
    %71 = arith.truncf %70 : vector<5x8xf32> to vector<5x8xbf16>
    %c0_38 = arith.constant 0 : index
    %c0_39 = arith.constant 0 : index
    %c16_40 = arith.constant 16 : index
    %72 = vector.load %arg2[%c0_38, %c0_39, %c16_40] : memref<1x5x32xbf16, #tpu.memory_space<vmem>>, vector<1x5x8xbf16>
    %73 = vector.shape_cast %72 : vector<1x5x8xbf16> to vector<5x8xbf16>
    %74 = vector.shape_cast %71 : vector<5x8xbf16> to vector<1x5x8xbf16>
    tpu.vector_store %arg2[%c0_38, %c0_39, %c16_40], %74 {strides = array<i32>} : memref<1x5x32xbf16, #tpu.memory_space<vmem>>, vector<1x5x8xbf16>,
    %c0_41 = arith.constant 0 : index
    %c0_42 = arith.constant 0 : index
    %c24 = arith.constant 24 : index
    %75 = vector.load %arg1[%c0_41, %c0_42, %c24] : memref<1x5x96xbf16, #tpu.memory_space<vmem>>, vector<1x5x8xbf16>
    %76 = vector.shape_cast %75 : vector<1x5x8xbf16> to vector<5x8xbf16>
    %c0_43 = arith.constant 0 : index
    %c0_44 = arith.constant 0 : index
    %c56 = arith.constant 56 : index
    %77 = vector.load %arg1[%c0_43, %c0_44, %c56] : memref<1x5x96xbf16, #tpu.memory_space<vmem>>, vector<1x5x8xbf16>
    %78 = vector.shape_cast %77 : vector<1x5x8xbf16> to vector<5x8xbf16>
    %c0_45 = arith.constant 0 : index
    %c0_46 = arith.constant 0 : index
    %c88 = arith.constant 88 : index
    %79 = vector.load %arg1[%c0_45, %c0_46, %c88] : memref<1x5x96xbf16, #tpu.memory_space<vmem>>, vector<1x5x8xbf16>
    %80 = vector.shape_cast %79 : vector<1x5x8xbf16> to vector<5x8xbf16>
    %cst_47 = arith.constant dense<0.000000e+00> : vector<5x5xf32>
    %81 = tpu.matmul %76, %78, %cst_47 {dimension_numbers = #tpu.dot_dimension_numbers<[1], [1], [0], [0], [0, 0, 1, 0], [], []>} : vector<5x8xbf16>, vector<5x8xbf16>, vector<5x5xf32> -> vector<5x5xf32>
    %cst_48 = arith.constant 0.353553385 : f32
    %82 = vector.broadcast %cst_48 : f32 to vector<5x5xf32>
    %83 = arith.mulf %81, %82 : vector<5x5xf32>
    %cst_49 = arith.constant dense<0xFF800000> : vector<5xf32>
    %84 = vector.multi_reduction <maximumf>, %83, %cst_49 [1] : vector<5x5xf32> to vector<5xf32>
    %85 = vector.shape_cast %84 : vector<5xf32> to vector<5x1xf32>
    %86 = vector.broadcast %85 : vector<5x1xf32> to vector<5x5xf32>
    %87 = arith.subf %83, %86 : vector<5x5xf32>
    %88 = math.exp %87 : vector<5x5xf32>
    %cst_50 = arith.constant dense<0.000000e+00> : vector<5xf32>
    %89 = vector.multi_reduction <add>, %88, %cst_50 [1] : vector<5x5xf32> to vector<5xf32>
    %90 = vector.shape_cast %89 : vector<5xf32> to vector<5x1xf32>
    %91 = tpu.reciprocal %90 {approx = true} : vector<5x1xf32> -> vector<5x1xf32>
    %92 = vector.broadcast %91 : vector<5x1xf32> to vector<5x5xf32>
    %93 = arith.mulf %88, %92 : vector<5x5xf32>
    %94 = arith.truncf %93 : vector<5x5xf32> to vector<5x5xbf16>
    %cst_51 = arith.constant dense<0.000000e+00> : vector<5x8xf32>
    %95 = tpu.matmul %94, %80, %cst_51 {dimension_numbers = #tpu.dot_dimension_numbers<[1], [0], [0], [1], [0, 0, 1, 1], [], []>} : vector<5x5xbf16>, vector<5x8xbf16>, vector<5x8xf32> -> vector<5x8xf32>
    %96 = arith.truncf %95 : vector<5x8xf32> to vector<5x8xbf16>
    %c0_52 = arith.constant 0 : index
    %c0_53 = arith.constant 0 : index
    %c24_54 = arith.constant 24 : index
    %97 = vector.load %arg2[%c0_52, %c0_53, %c24_54] : memref<1x5x32xbf16, #tpu.memory_space<vmem>>, vector<1x5x8xbf16>
    %98 = vector.shape_cast %97 : vector<1x5x8xbf16> to vector<5x8xbf16>
    %99 = vector.shape_cast %96 : vector<5x8xbf16> to vector<1x5x8xbf16>
    tpu.vector_store %arg2[%c0_52, %c0_53, %c24_54], %99 {strides = array<i32>} : memref<1x5x32xbf16, #tpu.memory_space<vmem>>, vector<1x5x8xbf16>,
    return
  }
  func.func @transform_0(%arg0: i32) -> (i32, i32, i32) {
    %c0_i32 = arith.constant 0 : i32
    %c0_i32_0 = arith.constant 0 : i32
    %c0_i32_1 = arith.constant 0 : i32
    return %arg0, %c0_i32, %c0_i32_0 : i32, i32, i32
  }
  func.func @transform_1(%arg0: i32) -> (i32, i32, i32) {
    %c0_i32 = arith.constant 0 : i32
    %c0_i32_0 = arith.constant 0 : i32
    %c0_i32_1 = arith.constant 0 : i32
    return %arg0, %c0_i32, %c0_i32_0 : i32, i32, i32
  }
}

module attributes {stable_mosaic.version = 11 : i64} {
  func.func @_ln_matmul_kernel(%arg0: i32, %arg1: i32, %arg2: memref<1x5x32xbf16, #tpu.memory_space<vmem>>, %arg3: memref<1x32xf32, #tpu.memory_space<vmem>>, %arg4: memref<1x32xf32, #tpu.memory_space<vmem>>, %arg5: memref<32x96xbf16, #tpu.memory_space<vmem>>, %arg6: memref<1x96xf32, #tpu.memory_space<vmem>>, %arg7: memref<1x5x96xbf16, #tpu.memory_space<vmem>>, %arg8: memref<5x32xbf16, #tpu.memory_space<vmem>>) attributes {dimension_semantics = [#tpu.dimension_semantics<parallel>, #tpu.dimension_semantics<arbitrary>], iteration_bounds = array<i64: 2, 1>, scalar_prefetch = 0 : i64, scratch_operands = 1 : i64, tpu.core_type = #tpu.core_type<tc>, window_params = [{transform_indices = @transform_0, window_bounds = array<i64: 1, 5, 32>}, {pipeline_mode = #tpu.pipeline_mode<synchronous>, transform_indices = @transform_1, window_bounds = array<i64: 1, 32>}, {pipeline_mode = #tpu.pipeline_mode<synchronous>, transform_indices = @transform_2, window_bounds = array<i64: 1, 32>}, {transform_indices = @transform_3, window_bounds = array<i64: 32, 96>}, {transform_indices = @transform_4, window_bounds = array<i64: 1, 96>}, {transform_indices = @transform_5, window_bounds = array<i64: 1, 5, 96>}]} {
    %c0_i32 = arith.constant 0 : i32
    %0 = arith.cmpi eq, %arg1, %c0_i32 : i32
    %1 = arith.extui %0 : i1 to i32
    %c0_i32_0 = arith.constant 0 : i32
    %2 = arith.cmpi ne, %1, %c0_i32_0 : i32
    scf.if %2 {
      %c0_9 = arith.constant 0 : index
      %c0_10 = arith.constant 0 : index
      %c0_11 = arith.constant 0 : index
      %13 = vector.load %arg2[%c0_9, %c0_10, %c0_11] : memref<1x5x32xbf16, #tpu.memory_space<vmem>>, vector<1x5x32xbf16>
      %14 = vector.shape_cast %13 : vector<1x5x32xbf16> to vector<5x32xbf16>
      %15 = arith.extf %14 : vector<5x32xbf16> to vector<5x32xf32>
      %cst_12 = arith.constant dense<0.000000e+00> : vector<5xf32>
      %16 = vector.multi_reduction <add>, %15, %cst_12 [1] : vector<5x32xf32> to vector<5xf32>
      %17 = vector.shape_cast %16 : vector<5xf32> to vector<5x1xf32>
      %cst_13 = arith.constant 3.200000e+01 : f32
      %18 = vector.broadcast %cst_13 : f32 to vector<5x1xf32>
      %19 = arith.divf %17, %18 : vector<5x1xf32>
      %20 = vector.broadcast %19 : vector<5x1xf32> to vector<5x32xf32>
      %21 = arith.subf %15, %20 : vector<5x32xf32>
      %22 = arith.mulf %21, %21 : vector<5x32xf32>
      %cst_14 = arith.constant dense<0.000000e+00> : vector<5xf32>
      %23 = vector.multi_reduction <add>, %22, %cst_14 [1] : vector<5x32xf32> to vector<5xf32>
      %24 = vector.shape_cast %23 : vector<5xf32> to vector<5x1xf32>
      %cst_15 = arith.constant 3.200000e+01 : f32
      %25 = vector.broadcast %cst_15 : f32 to vector<5x1xf32>
      %26 = arith.divf %24, %25 : vector<5x1xf32>
      %cst_16 = arith.constant 9.99999974E-6 : f32
      %27 = vector.broadcast %cst_16 : f32 to vector<5x1xf32>
      %28 = arith.addf %26, %27 : vector<5x1xf32>
      %29 = math.rsqrt %28 : vector<5x1xf32>
      %30 = vector.broadcast %29 : vector<5x1xf32> to vector<5x32xf32>
      %31 = arith.mulf %21, %30 : vector<5x32xf32>
      %c0_17 = arith.constant 0 : index
      %c0_18 = arith.constant 0 : index
      %32 = vector.load %arg3[%c0_17, %c0_18] : memref<1x32xf32, #tpu.memory_space<vmem>>, vector<1x32xf32>
      %33 = vector.broadcast %32 : vector<1x32xf32> to vector<5x32xf32>
      %34 = arith.mulf %31, %33 : vector<5x32xf32>
      %c0_19 = arith.constant 0 : index
      %c0_20 = arith.constant 0 : index
      %35 = vector.load %arg4[%c0_19, %c0_20] : memref<1x32xf32, #tpu.memory_space<vmem>>, vector<1x32xf32>
      %36 = vector.broadcast %35 : vector<1x32xf32> to vector<5x32xf32>
      %37 = arith.addf %34, %36 : vector<5x32xf32>
      %38 = arith.truncf %37 : vector<5x32xf32> to vector<5x32xbf16>
      %c0_21 = arith.constant 0 : index
      %c0_22 = arith.constant 0 : index
      %39 = vector.load %arg8[%c0_21, %c0_22] : memref<5x32xbf16, #tpu.memory_space<vmem>>, vector<5x32xbf16>
      tpu.vector_store %arg8[%c0_21, %c0_22], %38 {strides = array<i32>} : memref<5x32xbf16, #tpu.memory_space<vmem>>, vector<5x32xbf16>,
    } else {
    }
    %c0 = arith.constant 0 : index
    %c0_1 = arith.constant 0 : index
    %3 = vector.load %arg8[%c0, %c0_1] : memref<5x32xbf16, #tpu.memory_space<vmem>>, vector<5x32xbf16>
    %c0_2 = arith.constant 0 : index
    %c0_3 = arith.constant 0 : index
    %4 = vector.load %arg5[%c0_2, %c0_3] : memref<32x96xbf16, #tpu.memory_space<vmem>>, vector<32x96xbf16>
    %cst = arith.constant dense<0.000000e+00> : vector<5x96xf32>
    %5 = tpu.matmul %3, %4, %cst {dimension_numbers = #tpu.dot_dimension_numbers<[1], [0], [0], [1], [0, 0, 1, 1], [], []>} : vector<5x32xbf16>, vector<32x96xbf16>, vector<5x96xf32> -> vector<5x96xf32>
    %c0_4 = arith.constant 0 : index
    %c0_5 = arith.constant 0 : index
    %6 = vector.load %arg6[%c0_4, %c0_5] : memref<1x96xf32, #tpu.memory_space<vmem>>, vector<1x96xf32>
    %7 = vector.broadcast %6 : vector<1x96xf32> to vector<5x96xf32>
    %8 = arith.addf %5, %7 : vector<5x96xf32>
    %9 = arith.truncf %8 : vector<5x96xf32> to vector<5x96xbf16>
    %c0_6 = arith.constant 0 : index
    %c0_7 = arith.constant 0 : index
    %c0_8 = arith.constant 0 : index
    %10 = vector.load %arg7[%c0_6, %c0_7, %c0_8] : memref<1x5x96xbf16, #tpu.memory_space<vmem>>, vector<1x5x96xbf16>
    %11 = vector.shape_cast %10 : vector<1x5x96xbf16> to vector<5x96xbf16>
    %12 = vector.shape_cast %9 : vector<5x96xbf16> to vector<1x5x96xbf16>
    tpu.vector_store %arg7[%c0_6, %c0_7, %c0_8], %12 {strides = array<i32>} : memref<1x5x96xbf16, #tpu.memory_space<vmem>>, vector<1x5x96xbf16>,
    return
  }
  func.func @transform_0(%arg0: i32, %arg1: i32) -> (i32, i32, i32) {
    %c0_i32 = arith.constant 0 : i32
    %c0_i32_0 = arith.constant 0 : i32
    %c0_i32_1 = arith.constant 0 : i32
    return %arg0, %c0_i32, %c0_i32_0 : i32, i32, i32
  }
  func.func @transform_1(%arg0: i32, %arg1: i32) -> (i32, i32) {
    %c0_i32 = arith.constant 0 : i32
    %c0_i32_0 = arith.constant 0 : i32
    %c0_i32_1 = arith.constant 0 : i32
    return %c0_i32, %c0_i32_0 : i32, i32
  }
  func.func @transform_2(%arg0: i32, %arg1: i32) -> (i32, i32) {
    %c0_i32 = arith.constant 0 : i32
    %c0_i32_0 = arith.constant 0 : i32
    %c0_i32_1 = arith.constant 0 : i32
    return %c0_i32, %c0_i32_0 : i32, i32
  }
  func.func @transform_3(%arg0: i32, %arg1: i32) -> (i32, i32) {
    %c0_i32 = arith.constant 0 : i32
    %c0_i32_0 = arith.constant 0 : i32
    return %c0_i32, %arg1 : i32, i32
  }
  func.func @transform_4(%arg0: i32, %arg1: i32) -> (i32, i32) {
    %c0_i32 = arith.constant 0 : i32
    %c0_i32_0 = arith.constant 0 : i32
    return %c0_i32, %arg1 : i32, i32
  }
  func.func @transform_5(%arg0: i32, %arg1: i32) -> (i32, i32, i32) {
    %c0_i32 = arith.constant 0 : i32
    %c0_i32_0 = arith.constant 0 : i32
    return %arg0, %c0_i32, %arg1 : i32, i32, i32
  }
}

module attributes {stable_mosaic.version = 11 : i64} {
  func.func @_ln_matmul_kernel(%arg0: i32, %arg1: i32, %arg2: memref<1x5x32xbf16, #tpu.memory_space<vmem>>, %arg3: memref<1x32xf32, #tpu.memory_space<vmem>>, %arg4: memref<1x32xf32, #tpu.memory_space<vmem>>, %arg5: memref<32x128xbf16, #tpu.memory_space<vmem>>, %arg6: memref<1x128xf32, #tpu.memory_space<vmem>>, %arg7: memref<1x5x128xbf16, #tpu.memory_space<vmem>>, %arg8: memref<5x32xbf16, #tpu.memory_space<vmem>>) attributes {dimension_semantics = [#tpu.dimension_semantics<parallel>, #tpu.dimension_semantics<arbitrary>], iteration_bounds = array<i64: 2, 1>, scalar_prefetch = 0 : i64, scratch_operands = 1 : i64, tpu.core_type = #tpu.core_type<tc>, window_params = [{transform_indices = @transform_0, window_bounds = array<i64: 1, 5, 32>}, {pipeline_mode = #tpu.pipeline_mode<synchronous>, transform_indices = @transform_1, window_bounds = array<i64: 1, 32>}, {pipeline_mode = #tpu.pipeline_mode<synchronous>, transform_indices = @transform_2, window_bounds = array<i64: 1, 32>}, {transform_indices = @transform_3, window_bounds = array<i64: 32, 128>}, {transform_indices = @transform_4, window_bounds = array<i64: 1, 128>}, {transform_indices = @transform_5, window_bounds = array<i64: 1, 5, 128>}]} {
    %c0_i32 = arith.constant 0 : i32
    %0 = arith.cmpi eq, %arg1, %c0_i32 : i32
    %1 = arith.extui %0 : i1 to i32
    %c0_i32_0 = arith.constant 0 : i32
    %2 = arith.cmpi ne, %1, %c0_i32_0 : i32
    scf.if %2 {
      %c0_11 = arith.constant 0 : index
      %c0_12 = arith.constant 0 : index
      %c0_13 = arith.constant 0 : index
      %21 = vector.load %arg2[%c0_11, %c0_12, %c0_13] : memref<1x5x32xbf16, #tpu.memory_space<vmem>>, vector<1x5x32xbf16>
      %22 = vector.shape_cast %21 : vector<1x5x32xbf16> to vector<5x32xbf16>
      %23 = arith.extf %22 : vector<5x32xbf16> to vector<5x32xf32>
      %cst_14 = arith.constant dense<0.000000e+00> : vector<5xf32>
      %24 = vector.multi_reduction <add>, %23, %cst_14 [1] : vector<5x32xf32> to vector<5xf32>
      %25 = vector.shape_cast %24 : vector<5xf32> to vector<5x1xf32>
      %cst_15 = arith.constant 3.200000e+01 : f32
      %26 = vector.broadcast %cst_15 : f32 to vector<5x1xf32>
      %27 = arith.divf %25, %26 : vector<5x1xf32>
      %28 = vector.broadcast %27 : vector<5x1xf32> to vector<5x32xf32>
      %29 = arith.subf %23, %28 : vector<5x32xf32>
      %30 = arith.mulf %29, %29 : vector<5x32xf32>
      %cst_16 = arith.constant dense<0.000000e+00> : vector<5xf32>
      %31 = vector.multi_reduction <add>, %30, %cst_16 [1] : vector<5x32xf32> to vector<5xf32>
      %32 = vector.shape_cast %31 : vector<5xf32> to vector<5x1xf32>
      %cst_17 = arith.constant 3.200000e+01 : f32
      %33 = vector.broadcast %cst_17 : f32 to vector<5x1xf32>
      %34 = arith.divf %32, %33 : vector<5x1xf32>
      %cst_18 = arith.constant 9.99999974E-6 : f32
      %35 = vector.broadcast %cst_18 : f32 to vector<5x1xf32>
      %36 = arith.addf %34, %35 : vector<5x1xf32>
      %37 = math.rsqrt %36 : vector<5x1xf32>
      %38 = vector.broadcast %37 : vector<5x1xf32> to vector<5x32xf32>
      %39 = arith.mulf %29, %38 : vector<5x32xf32>
      %c0_19 = arith.constant 0 : index
      %c0_20 = arith.constant 0 : index
      %40 = vector.load %arg3[%c0_19, %c0_20] : memref<1x32xf32, #tpu.memory_space<vmem>>, vector<1x32xf32>
      %41 = vector.broadcast %40 : vector<1x32xf32> to vector<5x32xf32>
      %42 = arith.mulf %39, %41 : vector<5x32xf32>
      %c0_21 = arith.constant 0 : index
      %c0_22 = arith.constant 0 : index
      %43 = vector.load %arg4[%c0_21, %c0_22] : memref<1x32xf32, #tpu.memory_space<vmem>>, vector<1x32xf32>
      %44 = vector.broadcast %43 : vector<1x32xf32> to vector<5x32xf32>
      %45 = arith.addf %42, %44 : vector<5x32xf32>
      %46 = arith.truncf %45 : vector<5x32xf32> to vector<5x32xbf16>
      %c0_23 = arith.constant 0 : index
      %c0_24 = arith.constant 0 : index
      %47 = vector.load %arg8[%c0_23, %c0_24] : memref<5x32xbf16, #tpu.memory_space<vmem>>, vector<5x32xbf16>
      tpu.vector_store %arg8[%c0_23, %c0_24], %46 {strides = array<i32>} : memref<5x32xbf16, #tpu.memory_space<vmem>>, vector<5x32xbf16>,
    } else {
    }
    %c0 = arith.constant 0 : index
    %c0_1 = arith.constant 0 : index
    %3 = vector.load %arg8[%c0, %c0_1] : memref<5x32xbf16, #tpu.memory_space<vmem>>, vector<5x32xbf16>
    %c0_2 = arith.constant 0 : index
    %c0_3 = arith.constant 0 : index
    %4 = vector.load %arg5[%c0_2, %c0_3] : memref<32x128xbf16, #tpu.memory_space<vmem>>, vector<32x128xbf16>
    %cst = arith.constant dense<0.000000e+00> : vector<5x128xf32>
    %5 = tpu.matmul %3, %4, %cst {dimension_numbers = #tpu.dot_dimension_numbers<[1], [0], [0], [1], [0, 0, 1, 1], [], []>} : vector<5x32xbf16>, vector<32x128xbf16>, vector<5x128xf32> -> vector<5x128xf32>
    %c0_4 = arith.constant 0 : index
    %c0_5 = arith.constant 0 : index
    %6 = vector.load %arg6[%c0_4, %c0_5] : memref<1x128xf32, #tpu.memory_space<vmem>>, vector<1x128xf32>
    %7 = vector.broadcast %6 : vector<1x128xf32> to vector<5x128xf32>
    %8 = arith.addf %5, %7 : vector<5x128xf32>
    %cst_6 = arith.constant 1.702000e+00 : f32
    %9 = vector.broadcast %cst_6 : f32 to vector<5x128xf32>
    %10 = arith.mulf %9, %8 : vector<5x128xf32>
    %11 = arith.negf %10 : vector<5x128xf32>
    %12 = math.exp %11 : vector<5x128xf32>
    %cst_7 = arith.constant 1.000000e+00 : f32
    %13 = vector.broadcast %cst_7 : f32 to vector<5x128xf32>
    %14 = arith.addf %13, %12 : vector<5x128xf32>
    %15 = arith.divf %13, %14 : vector<5x128xf32>
    %16 = arith.mulf %8, %15 : vector<5x128xf32>
    %17 = arith.truncf %16 : vector<5x128xf32> to vector<5x128xbf16>
    %c0_8 = arith.constant 0 : index
    %c0_9 = arith.constant 0 : index
    %c0_10 = arith.constant 0 : index
    %18 = vector.load %arg7[%c0_8, %c0_9, %c0_10] : memref<1x5x128xbf16, #tpu.memory_space<vmem>>, vector<1x5x128xbf16>
    %19 = vector.shape_cast %18 : vector<1x5x128xbf16> to vector<5x128xbf16>
    %20 = vector.shape_cast %17 : vector<5x128xbf16> to vector<1x5x128xbf16>
    tpu.vector_store %arg7[%c0_8, %c0_9, %c0_10], %20 {strides = array<i32>} : memref<1x5x128xbf16, #tpu.memory_space<vmem>>, vector<1x5x128xbf16>,
    return
  }
  func.func @transform_0(%arg0: i32, %arg1: i32) -> (i32, i32, i32) {
    %c0_i32 = arith.constant 0 : i32
    %c0_i32_0 = arith.constant 0 : i32
    %c0_i32_1 = arith.constant 0 : i32
    return %arg0, %c0_i32, %c0_i32_0 : i32, i32, i32
  }
  func.func @transform_1(%arg0: i32, %arg1: i32) -> (i32, i32) {
    %c0_i32 = arith.constant 0 : i32
    %c0_i32_0 = arith.constant 0 : i32
    %c0_i32_1 = arith.constant 0 : i32
    return %c0_i32, %c0_i32_0 : i32, i32
  }
  func.func @transform_2(%arg0: i32, %arg1: i32) -> (i32, i32) {
    %c0_i32 = arith.constant 0 : i32
    %c0_i32_0 = arith.constant 0 : i32
    %c0_i32_1 = arith.constant 0 : i32
    return %c0_i32, %c0_i32_0 : i32, i32
  }
  func.func @transform_3(%arg0: i32, %arg1: i32) -> (i32, i32) {
    %c0_i32 = arith.constant 0 : i32
    %c0_i32_0 = arith.constant 0 : i32
    return %c0_i32, %arg1 : i32, i32
  }
  func.func @transform_4(%arg0: i32, %arg1: i32) -> (i32, i32) {
    %c0_i32 = arith.constant 0 : i32
    %c0_i32_0 = arith.constant 0 : i32
    return %c0_i32, %arg1 : i32, i32
  }
  func.func @transform_5(%arg0: i32, %arg1: i32) -> (i32, i32, i32) {
    %c0_i32 = arith.constant 0 : i32
    %c0_i32_0 = arith.constant 0 : i32
    return %arg0, %c0_i32, %arg1 : i32, i32, i32
  }
}

module attributes {stable_mosaic.version = 11 : i64} {
  func.func @_matmul_residual_kernel(%arg0: i32, %arg1: i32, %arg2: i32, %arg3: memref<1x5x32xbf16, #tpu.memory_space<vmem>>, %arg4: memref<32x32xbf16, #tpu.memory_space<vmem>>, %arg5: memref<1x32xf32, #tpu.memory_space<vmem>>, %arg6: memref<1x5x32xbf16, #tpu.memory_space<vmem>>, %arg7: memref<1x5x32xbf16, #tpu.memory_space<vmem>>, %arg8: memref<5x32xf32, #tpu.memory_space<vmem>>) attributes {dimension_semantics = [#tpu.dimension_semantics<parallel>, #tpu.dimension_semantics<parallel>, #tpu.dimension_semantics<arbitrary>], iteration_bounds = array<i64: 2, 1, 1>, scalar_prefetch = 0 : i64, scratch_operands = 1 : i64, tpu.core_type = #tpu.core_type<tc>, window_params = [{transform_indices = @transform_0, window_bounds = array<i64: 1, 5, 32>}, {transform_indices = @transform_1, window_bounds = array<i64: 32, 32>}, {transform_indices = @transform_2, window_bounds = array<i64: 1, 32>}, {transform_indices = @transform_3, window_bounds = array<i64: 1, 5, 32>}, {transform_indices = @transform_4, window_bounds = array<i64: 1, 5, 32>}]} {
    %c0_i32 = arith.constant 0 : i32
    %0 = arith.cmpi eq, %arg2, %c0_i32 : i32
    %1 = arith.extui %0 : i1 to i32
    %c0_i32_0 = arith.constant 0 : i32
    %2 = arith.cmpi ne, %1, %c0_i32_0 : i32
    scf.if %2 {
      %cst_11 = arith.constant 0.000000e+00 : f32
      %13 = vector.broadcast %cst_11 : f32 to vector<5x32xf32>
      %c0_12 = arith.constant 0 : index
      %c0_13 = arith.constant 0 : index
      %14 = vector.load %arg8[%c0_12, %c0_13] : memref<5x32xf32, #tpu.memory_space<vmem>>, vector<5x32xf32>
      tpu.vector_store %arg8[%c0_12, %c0_13], %13 {strides = array<i32>} : memref<5x32xf32, #tpu.memory_space<vmem>>, vector<5x32xf32>,
    } else {
    }
    %c0 = arith.constant 0 : index
    %c0_1 = arith.constant 0 : index
    %3 = vector.load %arg8[%c0, %c0_1] : memref<5x32xf32, #tpu.memory_space<vmem>>, vector<5x32xf32>
    %c0_2 = arith.constant 0 : index
    %c0_3 = arith.constant 0 : index
    %c0_4 = arith.constant 0 : index
    %4 = vector.load %arg3[%c0_2, %c0_3, %c0_4] : memref<1x5x32xbf16, #tpu.memory_space<vmem>>, vector<1x5x32xbf16>
    %5 = vector.shape_cast %4 : vector<1x5x32xbf16> to vector<5x32xbf16>
    %c0_5 = arith.constant 0 : index
    %c0_6 = arith.constant 0 : index
    %6 = vector.load %arg4[%c0_5, %c0_6] : memref<32x32xbf16, #tpu.memory_space<vmem>>, vector<32x32xbf16>
    %cst = arith.constant dense<0.000000e+00> : vector<5x32xf32>
    %7 = tpu.matmul %5, %6, %cst {dimension_numbers = #tpu.dot_dimension_numbers<[1], [0], [0], [1], [0, 0, 1, 1], [], []>} : vector<5x32xbf16>, vector<32x32xbf16>, vector<5x32xf32> -> vector<5x32xf32>
    %8 = arith.addf %3, %7 : vector<5x32xf32>
    %c0_7 = arith.constant 0 : index
    %c0_8 = arith.constant 0 : index
    %9 = vector.load %arg8[%c0_7, %c0_8] : memref<5x32xf32, #tpu.memory_space<vmem>>, vector<5x32xf32>
    tpu.vector_store %arg8[%c0_7, %c0_8], %8 {strides = array<i32>} : memref<5x32xf32, #tpu.memory_space<vmem>>, vector<5x32xf32>,
    %c0_i32_9 = arith.constant 0 : i32
    %10 = arith.cmpi eq, %arg2, %c0_i32_9 : i32
    %11 = arith.extui %10 : i1 to i32
    %c0_i32_10 = arith.constant 0 : i32
    %12 = arith.cmpi ne, %11, %c0_i32_10 : i32
    scf.if %12 {
      %c0_11 = arith.constant 0 : index
      %c0_12 = arith.constant 0 : index
      %13 = vector.load %arg8[%c0_11, %c0_12] : memref<5x32xf32, #tpu.memory_space<vmem>>, vector<5x32xf32>
      %c0_13 = arith.constant 0 : index
      %c0_14 = arith.constant 0 : index
      %14 = vector.load %arg5[%c0_13, %c0_14] : memref<1x32xf32, #tpu.memory_space<vmem>>, vector<1x32xf32>
      %15 = vector.broadcast %14 : vector<1x32xf32> to vector<5x32xf32>
      %16 = arith.addf %13, %15 : vector<5x32xf32>
      %c0_15 = arith.constant 0 : index
      %c0_16 = arith.constant 0 : index
      %c0_17 = arith.constant 0 : index
      %17 = vector.load %arg6[%c0_15, %c0_16, %c0_17] : memref<1x5x32xbf16, #tpu.memory_space<vmem>>, vector<1x5x32xbf16>
      %18 = vector.shape_cast %17 : vector<1x5x32xbf16> to vector<5x32xbf16>
      %19 = arith.extf %18 : vector<5x32xbf16> to vector<5x32xf32>
      %20 = arith.addf %16, %19 : vector<5x32xf32>
      %21 = arith.truncf %20 : vector<5x32xf32> to vector<5x32xbf16>
      %c0_18 = arith.constant 0 : index
      %c0_19 = arith.constant 0 : index
      %c0_20 = arith.constant 0 : index
      %22 = vector.load %arg7[%c0_18, %c0_19, %c0_20] : memref<1x5x32xbf16, #tpu.memory_space<vmem>>, vector<1x5x32xbf16>
      %23 = vector.shape_cast %22 : vector<1x5x32xbf16> to vector<5x32xbf16>
      %24 = vector.shape_cast %21 : vector<5x32xbf16> to vector<1x5x32xbf16>
      tpu.vector_store %arg7[%c0_18, %c0_19, %c0_20], %24 {strides = array<i32>} : memref<1x5x32xbf16, #tpu.memory_space<vmem>>, vector<1x5x32xbf16>,
    } else {
    }
    return
  }
  func.func @transform_0(%arg0: i32, %arg1: i32, %arg2: i32) -> (i32, i32, i32) {
    %c0_i32 = arith.constant 0 : i32
    %c0_i32_0 = arith.constant 0 : i32
    return %arg0, %c0_i32, %arg2 : i32, i32, i32
  }
  func.func @transform_1(%arg0: i32, %arg1: i32, %arg2: i32) -> (i32, i32) {
    %c0_i32 = arith.constant 0 : i32
    return %arg2, %arg1 : i32, i32
  }
  func.func @transform_2(%arg0: i32, %arg1: i32, %arg2: i32) -> (i32, i32) {
    %c0_i32 = arith.constant 0 : i32
    %c0_i32_0 = arith.constant 0 : i32
    return %c0_i32, %arg1 : i32, i32
  }
  func.func @transform_3(%arg0: i32, %arg1: i32, %arg2: i32) -> (i32, i32, i32) {
    %c0_i32 = arith.constant 0 : i32
    %c0_i32_0 = arith.constant 0 : i32
    return %arg0, %c0_i32, %arg1 : i32, i32, i32
  }
  func.func @transform_4(%arg0: i32, %arg1: i32, %arg2: i32) -> (i32, i32, i32) {
    %c0_i32 = arith.constant 0 : i32
    %c0_i32_0 = arith.constant 0 : i32
    return %arg0, %c0_i32, %arg1 : i32, i32, i32
  }
}

module attributes {stable_mosaic.version = 11 : i64} {
  func.func @_matmul_residual_kernel(%arg0: i32, %arg1: i32, %arg2: i32, %arg3: memref<1x5x128xbf16, #tpu.memory_space<vmem>>, %arg4: memref<128x32xbf16, #tpu.memory_space<vmem>>, %arg5: memref<1x32xf32, #tpu.memory_space<vmem>>, %arg6: memref<1x5x32xbf16, #tpu.memory_space<vmem>>, %arg7: memref<1x5x32xbf16, #tpu.memory_space<vmem>>, %arg8: memref<5x32xf32, #tpu.memory_space<vmem>>) attributes {dimension_semantics = [#tpu.dimension_semantics<parallel>, #tpu.dimension_semantics<parallel>, #tpu.dimension_semantics<arbitrary>], iteration_bounds = array<i64: 2, 1, 1>, scalar_prefetch = 0 : i64, scratch_operands = 1 : i64, tpu.core_type = #tpu.core_type<tc>, window_params = [{transform_indices = @transform_0, window_bounds = array<i64: 1, 5, 128>}, {transform_indices = @transform_1, window_bounds = array<i64: 128, 32>}, {transform_indices = @transform_2, window_bounds = array<i64: 1, 32>}, {transform_indices = @transform_3, window_bounds = array<i64: 1, 5, 32>}, {transform_indices = @transform_4, window_bounds = array<i64: 1, 5, 32>}]} {
    %c0_i32 = arith.constant 0 : i32
    %0 = arith.cmpi eq, %arg2, %c0_i32 : i32
    %1 = arith.extui %0 : i1 to i32
    %c0_i32_0 = arith.constant 0 : i32
    %2 = arith.cmpi ne, %1, %c0_i32_0 : i32
    scf.if %2 {
      %cst_11 = arith.constant 0.000000e+00 : f32
      %13 = vector.broadcast %cst_11 : f32 to vector<5x32xf32>
      %c0_12 = arith.constant 0 : index
      %c0_13 = arith.constant 0 : index
      %14 = vector.load %arg8[%c0_12, %c0_13] : memref<5x32xf32, #tpu.memory_space<vmem>>, vector<5x32xf32>
      tpu.vector_store %arg8[%c0_12, %c0_13], %13 {strides = array<i32>} : memref<5x32xf32, #tpu.memory_space<vmem>>, vector<5x32xf32>,
    } else {
    }
    %c0 = arith.constant 0 : index
    %c0_1 = arith.constant 0 : index
    %3 = vector.load %arg8[%c0, %c0_1] : memref<5x32xf32, #tpu.memory_space<vmem>>, vector<5x32xf32>
    %c0_2 = arith.constant 0 : index
    %c0_3 = arith.constant 0 : index
    %c0_4 = arith.constant 0 : index
    %4 = vector.load %arg3[%c0_2, %c0_3, %c0_4] : memref<1x5x128xbf16, #tpu.memory_space<vmem>>, vector<1x5x128xbf16>
    %5 = vector.shape_cast %4 : vector<1x5x128xbf16> to vector<5x128xbf16>
    %c0_5 = arith.constant 0 : index
    %c0_6 = arith.constant 0 : index
    %6 = vector.load %arg4[%c0_5, %c0_6] : memref<128x32xbf16, #tpu.memory_space<vmem>>, vector<128x32xbf16>
    %cst = arith.constant dense<0.000000e+00> : vector<5x32xf32>
    %7 = tpu.matmul %5, %6, %cst {dimension_numbers = #tpu.dot_dimension_numbers<[1], [0], [0], [1], [0, 0, 1, 1], [], []>} : vector<5x128xbf16>, vector<128x32xbf16>, vector<5x32xf32> -> vector<5x32xf32>
    %8 = arith.addf %3, %7 : vector<5x32xf32>
    %c0_7 = arith.constant 0 : index
    %c0_8 = arith.constant 0 : index
    %9 = vector.load %arg8[%c0_7, %c0_8] : memref<5x32xf32, #tpu.memory_space<vmem>>, vector<5x32xf32>
    tpu.vector_store %arg8[%c0_7, %c0_8], %8 {strides = array<i32>} : memref<5x32xf32, #tpu.memory_space<vmem>>, vector<5x32xf32>,
    %c0_i32_9 = arith.constant 0 : i32
    %10 = arith.cmpi eq, %arg2, %c0_i32_9 : i32
    %11 = arith.extui %10 : i1 to i32
    %c0_i32_10 = arith.constant 0 : i32
    %12 = arith.cmpi ne, %11, %c0_i32_10 : i32
    scf.if %12 {
      %c0_11 = arith.constant 0 : index
      %c0_12 = arith.constant 0 : index
      %13 = vector.load %arg8[%c0_11, %c0_12] : memref<5x32xf32, #tpu.memory_space<vmem>>, vector<5x32xf32>
      %c0_13 = arith.constant 0 : index
      %c0_14 = arith.constant 0 : index
      %14 = vector.load %arg5[%c0_13, %c0_14] : memref<1x32xf32, #tpu.memory_space<vmem>>, vector<1x32xf32>
      %15 = vector.broadcast %14 : vector<1x32xf32> to vector<5x32xf32>
      %16 = arith.addf %13, %15 : vector<5x32xf32>
      %c0_15 = arith.constant 0 : index
      %c0_16 = arith.constant 0 : index
      %c0_17 = arith.constant 0 : index
      %17 = vector.load %arg6[%c0_15, %c0_16, %c0_17] : memref<1x5x32xbf16, #tpu.memory_space<vmem>>, vector<1x5x32xbf16>
      %18 = vector.shape_cast %17 : vector<1x5x32xbf16> to vector<5x32xbf16>
      %19 = arith.extf %18 : vector<5x32xbf16> to vector<5x32xf32>
      %20 = arith.addf %16, %19 : vector<5x32xf32>
      %21 = arith.truncf %20 : vector<5x32xf32> to vector<5x32xbf16>
      %c0_18 = arith.constant 0 : index
      %c0_19 = arith.constant 0 : index
      %c0_20 = arith.constant 0 : index
      %22 = vector.load %arg7[%c0_18, %c0_19, %c0_20] : memref<1x5x32xbf16, #tpu.memory_space<vmem>>, vector<1x5x32xbf16>
      %23 = vector.shape_cast %22 : vector<1x5x32xbf16> to vector<5x32xbf16>
      %24 = vector.shape_cast %21 : vector<5x32xbf16> to vector<1x5x32xbf16>
      tpu.vector_store %arg7[%c0_18, %c0_19, %c0_20], %24 {strides = array<i32>} : memref<1x5x32xbf16, #tpu.memory_space<vmem>>, vector<1x5x32xbf16>,
    } else {
    }
    return
  }
  func.func @transform_0(%arg0: i32, %arg1: i32, %arg2: i32) -> (i32, i32, i32) {
    %c0_i32 = arith.constant 0 : i32
    %c0_i32_0 = arith.constant 0 : i32
    return %arg0, %c0_i32, %arg2 : i32, i32, i32
  }
  func.func @transform_1(%arg0: i32, %arg1: i32, %arg2: i32) -> (i32, i32) {
    %c0_i32 = arith.constant 0 : i32
    return %arg2, %arg1 : i32, i32
  }
  func.func @transform_2(%arg0: i32, %arg1: i32, %arg2: i32) -> (i32, i32) {
    %c0_i32 = arith.constant 0 : i32
    %c0_i32_0 = arith.constant 0 : i32
    return %c0_i32, %arg1 : i32, i32
  }
  func.func @transform_3(%arg0: i32, %arg1: i32, %arg2: i32) -> (i32, i32, i32) {
    %c0_i32 = arith.constant 0 : i32
    %c0_i32_0 = arith.constant 0 : i32
    return %arg0, %c0_i32, %arg1 : i32, i32, i32
  }
  func.func @transform_4(%arg0: i32, %arg1: i32, %arg2: i32) -> (i32, i32, i32) {
    %c0_i32 = arith.constant 0 : i32
    %c0_i32_0 = arith.constant 0 : i32
    return %arg0, %c0_i32, %arg1 : i32, i32, i32
  }
}

module attributes {stable_mosaic.version = 11 : i64} {
  func.func @_ln_matmul_kernel(%arg0: i32, %arg1: i32, %arg2: memref<1x1x32xbf16, #tpu.memory_space<vmem>>, %arg3: memref<1x32xf32, #tpu.memory_space<vmem>>, %arg4: memref<1x32xf32, #tpu.memory_space<vmem>>, %arg5: memref<32x16xbf16, #tpu.memory_space<vmem>>, %arg6: memref<1x16xf32, #tpu.memory_space<vmem>>, %arg7: memref<1x1x16xf32, #tpu.memory_space<vmem>>, %arg8: memref<1x32xbf16, #tpu.memory_space<vmem>>) attributes {dimension_semantics = [#tpu.dimension_semantics<parallel>, #tpu.dimension_semantics<arbitrary>], iteration_bounds = array<i64: 2, 1>, scalar_prefetch = 0 : i64, scratch_operands = 1 : i64, tpu.core_type = #tpu.core_type<tc>, window_params = [{transform_indices = @transform_0, window_bounds = array<i64: 1, 1, 32>}, {pipeline_mode = #tpu.pipeline_mode<synchronous>, transform_indices = @transform_1, window_bounds = array<i64: 1, 32>}, {pipeline_mode = #tpu.pipeline_mode<synchronous>, transform_indices = @transform_2, window_bounds = array<i64: 1, 32>}, {transform_indices = @transform_3, window_bounds = array<i64: 32, 16>}, {transform_indices = @transform_4, window_bounds = array<i64: 1, 16>}, {transform_indices = @transform_5, window_bounds = array<i64: 1, 1, 16>}]} {
    %c0_i32 = arith.constant 0 : i32
    %0 = arith.cmpi eq, %arg1, %c0_i32 : i32
    %1 = arith.extui %0 : i1 to i32
    %c0_i32_0 = arith.constant 0 : i32
    %2 = arith.cmpi ne, %1, %c0_i32_0 : i32
    scf.if %2 {
      %c0_9 = arith.constant 0 : index
      %c0_10 = arith.constant 0 : index
      %c0_11 = arith.constant 0 : index
      %11 = vector.load %arg2[%c0_9, %c0_10, %c0_11] : memref<1x1x32xbf16, #tpu.memory_space<vmem>>, vector<1x1x32xbf16>
      %12 = vector.shape_cast %11 : vector<1x1x32xbf16> to vector<1x32xbf16>
      %13 = arith.extf %12 : vector<1x32xbf16> to vector<1x32xf32>
      %cst_12 = arith.constant dense<0.000000e+00> : vector<1xf32>
      %14 = vector.multi_reduction <add>, %13, %cst_12 [1] : vector<1x32xf32> to vector<1xf32>
      %15 = vector.shape_cast %14 : vector<1xf32> to vector<1x1xf32>
      %cst_13 = arith.constant 3.200000e+01 : f32
      %16 = vector.broadcast %cst_13 : f32 to vector<1x1xf32>
      %17 = arith.divf %15, %16 : vector<1x1xf32>
      %18 = vector.broadcast %17 : vector<1x1xf32> to vector<1x32xf32>
      %19 = arith.subf %13, %18 : vector<1x32xf32>
      %20 = arith.mulf %19, %19 : vector<1x32xf32>
      %cst_14 = arith.constant dense<0.000000e+00> : vector<1xf32>
      %21 = vector.multi_reduction <add>, %20, %cst_14 [1] : vector<1x32xf32> to vector<1xf32>
      %22 = vector.shape_cast %21 : vector<1xf32> to vector<1x1xf32>
      %cst_15 = arith.constant 3.200000e+01 : f32
      %23 = vector.broadcast %cst_15 : f32 to vector<1x1xf32>
      %24 = arith.divf %22, %23 : vector<1x1xf32>
      %cst_16 = arith.constant 9.99999974E-6 : f32
      %25 = vector.broadcast %cst_16 : f32 to vector<1x1xf32>
      %26 = arith.addf %24, %25 : vector<1x1xf32>
      %27 = math.rsqrt %26 : vector<1x1xf32>
      %28 = vector.broadcast %27 : vector<1x1xf32> to vector<1x32xf32>
      %29 = arith.mulf %19, %28 : vector<1x32xf32>
      %c0_17 = arith.constant 0 : index
      %c0_18 = arith.constant 0 : index
      %30 = vector.load %arg3[%c0_17, %c0_18] : memref<1x32xf32, #tpu.memory_space<vmem>>, vector<1x32xf32>
      %31 = arith.mulf %29, %30 : vector<1x32xf32>
      %c0_19 = arith.constant 0 : index
      %c0_20 = arith.constant 0 : index
      %32 = vector.load %arg4[%c0_19, %c0_20] : memref<1x32xf32, #tpu.memory_space<vmem>>, vector<1x32xf32>
      %33 = arith.addf %31, %32 : vector<1x32xf32>
      %34 = arith.truncf %33 : vector<1x32xf32> to vector<1x32xbf16>
      %c0_21 = arith.constant 0 : index
      %c0_22 = arith.constant 0 : index
      %35 = vector.load %arg8[%c0_21, %c0_22] : memref<1x32xbf16, #tpu.memory_space<vmem>>, vector<1x32xbf16>
      tpu.vector_store %arg8[%c0_21, %c0_22], %34 {strides = array<i32>} : memref<1x32xbf16, #tpu.memory_space<vmem>>, vector<1x32xbf16>,
    } else {
    }
    %c0 = arith.constant 0 : index
    %c0_1 = arith.constant 0 : index
    %3 = vector.load %arg8[%c0, %c0_1] : memref<1x32xbf16, #tpu.memory_space<vmem>>, vector<1x32xbf16>
    %c0_2 = arith.constant 0 : index
    %c0_3 = arith.constant 0 : index
    %4 = vector.load %arg5[%c0_2, %c0_3] : memref<32x16xbf16, #tpu.memory_space<vmem>>, vector<32x16xbf16>
    %cst = arith.constant dense<0.000000e+00> : vector<1x16xf32>
    %5 = tpu.matmul %3, %4, %cst {dimension_numbers = #tpu.dot_dimension_numbers<[1], [0], [0], [1], [0, 0, 1, 1], [], []>} : vector<1x32xbf16>, vector<32x16xbf16>, vector<1x16xf32> -> vector<1x16xf32>
    %c0_4 = arith.constant 0 : index
    %c0_5 = arith.constant 0 : index
    %6 = vector.load %arg6[%c0_4, %c0_5] : memref<1x16xf32, #tpu.memory_space<vmem>>, vector<1x16xf32>
    %7 = arith.addf %5, %6 : vector<1x16xf32>
    %c0_6 = arith.constant 0 : index
    %c0_7 = arith.constant 0 : index
    %c0_8 = arith.constant 0 : index
    %8 = vector.load %arg7[%c0_6, %c0_7, %c0_8] : memref<1x1x16xf32, #tpu.memory_space<vmem>>, vector<1x1x16xf32>
    %9 = vector.shape_cast %8 : vector<1x1x16xf32> to vector<1x16xf32>
    %10 = vector.shape_cast %7 : vector<1x16xf32> to vector<1x1x16xf32>
    tpu.vector_store %arg7[%c0_6, %c0_7, %c0_8], %10 {strides = array<i32>} : memref<1x1x16xf32, #tpu.memory_space<vmem>>, vector<1x1x16xf32>,
    return
  }
  func.func @transform_0(%arg0: i32, %arg1: i32) -> (i32, i32, i32) {
    %c0_i32 = arith.constant 0 : i32
    %c0_i32_0 = arith.constant 0 : i32
    %c0_i32_1 = arith.constant 0 : i32
    return %arg0, %c0_i32, %c0_i32_0 : i32, i32, i32
  }
  func.func @transform_1(%arg0: i32, %arg1: i32) -> (i32, i32) {
    %c0_i32 = arith.constant 0 : i32
    %c0_i32_0 = arith.constant 0 : i32
    %c0_i32_1 = arith.constant 0 : i32
    return %c0_i32, %c0_i32_0 : i32, i32
  }
  func.func @transform_2(%arg0: i32, %arg1: i32) -> (i32, i32) {
    %c0_i32 = arith.constant 0 : i32
    %c0_i32_0 = arith.constant 0 : i32
    %c0_i32_1 = arith.constant 0 : i32
    return %c0_i32, %c0_i32_0 : i32, i32
  }
  func.func @transform_3(%arg0: i32, %arg1: i32) -> (i32, i32) {
    %c0_i32 = arith.constant 0 : i32
    %c0_i32_0 = arith.constant 0 : i32
    return %c0_i32, %arg1 : i32, i32
  }
  func.func @transform_4(%arg0: i32, %arg1: i32) -> (i32, i32) {
    %c0_i32 = arith.constant 0 : i32
    %c0_i32_0 = arith.constant 0 : i32
    return %c0_i32, %arg1 : i32, i32
  }
  func.func @transform_5(%arg0: i32, %arg1: i32) -> (i32, i32, i32) {
    %c0_i32 = arith.constant 0 : i32
    %c0_i32_0 = arith.constant 0 : i32
    return %arg0, %c0_i32, %arg1 : i32, i32, i32
  }
}

module attributes {stable_mosaic.version = 11 : i64} {
  func.func @_similarity_kernel(%arg0: i32, %arg1: memref<2x16xf32, #tpu.memory_space<vmem>>, %arg2: memref<16x8xbf16, #tpu.memory_space<vmem>>, %arg3: memref<2x8xf32, #tpu.memory_space<vmem>>) attributes {dimension_semantics = [#tpu.dimension_semantics<parallel>], iteration_bounds = array<i64: 1>, scalar_prefetch = 0 : i64, scratch_operands = 0 : i64, tpu.core_type = #tpu.core_type<tc>, window_params = [{pipeline_mode = #tpu.pipeline_mode<synchronous>, transform_indices = @transform_0, window_bounds = array<i64: 2, 16>}, {transform_indices = @transform_1, window_bounds = array<i64: 16, 8>}, {transform_indices = @transform_2, window_bounds = array<i64: 2, 8>}]} {
    %c0 = arith.constant 0 : index
    %c0_0 = arith.constant 0 : index
    %0 = vector.load %arg1[%c0, %c0_0] : memref<2x16xf32, #tpu.memory_space<vmem>>, vector<2x16xf32>
    %1 = arith.mulf %0, %0 : vector<2x16xf32>
    %cst = arith.constant dense<0.000000e+00> : vector<2xf32>
    %2 = vector.multi_reduction <add>, %1, %cst [1] : vector<2x16xf32> to vector<2xf32>
    %3 = vector.shape_cast %2 : vector<2xf32> to vector<2x1xf32>
    %4 = math.rsqrt %3 : vector<2x1xf32>
    %5 = vector.broadcast %4 : vector<2x1xf32> to vector<2x16xf32>
    %6 = arith.mulf %0, %5 : vector<2x16xf32>
    %7 = arith.truncf %6 : vector<2x16xf32> to vector<2x16xbf16>
    %c0_1 = arith.constant 0 : index
    %c0_2 = arith.constant 0 : index
    %8 = vector.load %arg2[%c0_1, %c0_2] : memref<16x8xbf16, #tpu.memory_space<vmem>>, vector<16x8xbf16>
    %cst_3 = arith.constant dense<0.000000e+00> : vector<2x8xf32>
    %9 = tpu.matmul %7, %8, %cst_3 {dimension_numbers = #tpu.dot_dimension_numbers<[1], [0], [0], [1], [0, 0, 1, 1], [], []>} : vector<2x16xbf16>, vector<16x8xbf16>, vector<2x8xf32> -> vector<2x8xf32>
    %c0_4 = arith.constant 0 : index
    %c0_5 = arith.constant 0 : index
    %10 = vector.load %arg3[%c0_4, %c0_5] : memref<2x8xf32, #tpu.memory_space<vmem>>, vector<2x8xf32>
    tpu.vector_store %arg3[%c0_4, %c0_5], %9 {strides = array<i32>} : memref<2x8xf32, #tpu.memory_space<vmem>>, vector<2x8xf32>,
    return
  }
  func.func @transform_0(%arg0: i32) -> (i32, i32) {
    %c0_i32 = arith.constant 0 : i32
    %c0_i32_0 = arith.constant 0 : i32
    %c0_i32_1 = arith.constant 0 : i32
    return %c0_i32, %c0_i32_0 : i32, i32
  }
  func.func @transform_1(%arg0: i32) -> (i32, i32) {
    %c0_i32 = arith.constant 0 : i32
    %c0_i32_0 = arith.constant 0 : i32
    return %c0_i32, %arg0 : i32, i32
  }
  func.func @transform_2(%arg0: i32) -> (i32, i32) {
    %c0_i32 = arith.constant 0 : i32
    %c0_i32_0 = arith.constant 0 : i32
    return %c0_i32, %arg0 : i32, i32
  }
}

</mosaic_0001>

<bundles_post_ra>
// kernel: clip_model_super_forward.16
= control target key start
LH: loop header
LB: loop body
LE: loop exit
PB: predicated region body
PF: predicated region fallthrough
CT: control target
= control target key end

     0   :  { %s578_s18 = smov 0   ;;  %s580_s19 = smov 0   ;;  %s637_s0 = inlined_call_operand.vmem [shape: bf16[2,5,32], index: 0, kind: input, shape index: {}]   ;;  %s638_s1 = inlined_call_operand.vmem [shape: f32[1,32], index: 1, kind: input, shape index: {}]   ;;  %s639_s2 = inlined_call_operand.vmem [shape: f32[1,32], index: 2, kind: input, shape index: {}]   ;;  %s640_s3 = inlined_call_operand.vmem [shape: bf16[32,96], index: 3, kind: input, shape index: {}]   ;;  %s641_s4 = inlined_call_operand.vmem [shape: f32[1,96], index: 4, kind: input, shape index: {}]   ;;  %s642_s5 = inlined_call_operand.vmem [shape: bf16[2,5,96], index: 5, kind: output, shape index: {}]  }
   0x1   :  { %s582_s20 = smov 0  }
   0x2 LB: > { %s27_s21 = sadd.s32 1, %s541_s19  ;;  %p475_p0 = scmp.ge.s32.totalorder %s545_s20, 1  ;;  %s545_s20 = sphi %s582_s20, %s15_s20   ;;  %s541_s19 = sphi %s580_s19, %s644_s19   ;;  %s537_s18 = sphi %s578_s18, %s643_s18  }
   0x3   : > { %p29_p1 = scmp.ge.s32.totalorder %s27_s21, 2  ;;  %p217_p2 = scmp.lt.s32.totalorder %s545_s20, 3 }
   0x5   : > { %s646_s21 = smov (%p29_p1, %s27_s21), 0  ;;  %p218_p3 = pnand %p475_p0, %p217_p2 }
   0x6   : > { %p253_p4 = scmp.lt.s32.totalorder (!%p218_p3), %s537_s18, 1 }
   0x7   : > { %221 = sbr.rel (%p218_p3) target bundleno = 431 (0x1af), region = 40 }
   0xc   : > { %s648_s18 = smov (!%p253_p4, %s537_s18), 1  ;;  %vm278_vm0 = vcmask 258048   ;;  %v547_v3 = vmov 32.0   ;;  %v490_v15 = vld [vmem:[%s640_s3 + $0x8] sm:$0xff]  ;;  %v489_v18 = vld [vmem:[%s640_s3] sm:$0xff]  ;;  %vm319_vm5 = vcmask 256000  }
   0xd   : > { %s476_s22 = sshll.u32 %s648_s18, 2  ;;  %519 = vrcp.f32 %v547_v3  ;;  %356 = vmatpush.bf16.msra.mxu0 %v490_v15  ;;  %v516_v26 = vld [vmem:[%s638_s1] ss:$0 sm:$0xff]  ;;  %vm320_vm6 = vsmask.f32 2304  ;;  %vm346_vm8 = vcmask 261120  }
   0xe   : > { %s256_s25 = scalar_lea.vmem %s637_s0, %s476_s22  ;;  %v517_v28 = vld [vmem:[%s639_s2] ss:$0 sm:$0xff]  ;;  %vm321_vm7 = vmand %vm319_vm5, %vm320_vm6  ;;  %s270_s13 = scalar_lea.vmem %s642_s5, %s476_s22  ;;  %vm364_vm9 = vcmask 780288  }
   0xf   : > { %v276_v0 = vld [vmem:[%s256_s25] sm:$0x7]  ;;  %vm366_vm10 = vmand %vm364_vm9, %vm320_vm6 }
  0x10   : > { %v277_v1 = vunpack.c.l.bf16 %v276_v0  ;;  %v322_v32 = vld [vmem:[#allocation2] sm:$0x7] }
  0x11   : > { %357 = vmatpush.bf16.msra.mxu0 %v489_v18  ;;  %v518_v36 = vld [vmem:[%s641_s4] ss:$0 sm:$0xff] }
  0x12   : > { %v279_v2 = vsel %vm278_vm0, %v277_v1, 0.0  ;;  %v367_v39 = vld [vmem:[%s270_s13] sm:$0x7] }
  0x13   : > { %280 = vadd.xlane.f32.xlu0 %v279_v2  ;;  %v520_v4 = vpop.eup %519 }
  0x14   : > { %v283_v5 = vmul.f32 32.0, %v520_v4  ;;  %vm287_vm1 = vweird.f32 %v520_v4 }
  0x16   : > { %v284_v6 = vsub.f32 1.0, %v283_v5 }
  0x18   : > { %v285_v7 = vmul.f32 %v520_v4, %v284_v6 }
  0x1a   : > { %v286_v8 = vadd.f32 %v520_v4, %v285_v7 }
  0x1c   : > { %v288_v9 = vsel %vm287_vm1, %v520_v4, %v286_v8 }
  0x86   : > { %v281_v10 = vpop.xlane.xlu0 %280 }
  0x87   : > { %v289_v11 = vmul.f32 %v288_v9, %v281_v10 }
  0x89   : > { %v290_v12 = vsub.f32 %v277_v1, %v289_v11 }
  0x8b   : > { %v291_v13 = vmul.f32 %v290_v12, %v290_v12 }
  0x8d   : > { %v292_v14 = vsel %vm278_vm0, %v291_v13, 0.0 }
  0x8e   : > { %293 = vadd.xlane.f32.xlu0 %v292_v14 }
 0x101   : > { %v294_v16 = vpop.xlane.xlu0 %293 }
 0x102   : > { %v295_v17 = vmul.f32 %v294_v16, %v288_v9 }
 0x104   : > { %v296_v19 = vadd.f32 1e-05, %v295_v17 }
 0x106   : > { %521 = vrsqrt.f32 %v296_v19  ;;  %vm303_vm3 = vweird.f32 %v296_v19 }
 0x10c   : > { %v522_v20 = vpop.eup %521 }
 0x10d   : > { %v298_v21 = vmul.f32 %v522_v20, %v296_v19  ;;  %vm304_vm2 = vweird.f32 %v522_v20 }
 0x10e   : > { %vm305_vm4 = vmor %vm303_vm3, %vm304_vm2 }
 0x10f   : > { %v299_v22 = vmul.f32 %v522_v20, %v298_v21 }
 0x111   : > { %v300_v23 = vmul.f32 0.5, %v299_v22 }
 0x113   : > { %v301_v24 = vsub.f32 1.5, %v300_v23 }
 0x115   : > { %v302_v25 = vmul.f32 %v522_v20, %v301_v24 }
 0x117   : > { %v306_v27 = vsel %vm305_vm4, %v522_v20, %v302_v25 }
 0x118   : > { %v307_v29 = vmul.f32 %v306_v27, %v290_v12 }
 0x11a   : > { %v312_v30 = vmul.f32 %v516_v26, %v307_v29 }
 0x11c   : > { %v317_v31 = vadd.f32 %v517_v28, %v312_v30 }
 0x11e   : > { %v318_v33 = vpack.c.bf16 %v317_v31, %v317_v31 }
 0x120   : > { %v323_v34 = vsel %vm321_vm7, %v318_v33, %v322_v32 }
 0x121   : > { %324 = vst [vmem:[#allocation2] sm:$0x7] %v323_v34 }
 0x128   : > { %v325_v35 = vld [vmem:[#allocation2] sm:$0x7] }
 0x129   : > { %486 = vmatmul.msk.bf16.vlgmr.msra.gmra.mxu0 %vm346_vm8, %v325_v35 }
 0x1a6   : > { %v359_v37 = vpop.f32.mrf.mxu0 }
 0x1a7   : > { %v360_v38 = vadd.f32 %v518_v36, %v359_v37 }
 0x1a9   : > { %v363_v40 = vpack.c.bf16 %v360_v38, %v360_v38 }
 0x1ab   : > { %v368_v41 = vsel %vm366_vm10, %v363_v40, %v367_v39 }
 0x1ac   : > { %369 = vst [vmem:[%s270_s13] sm:$0x7] %v368_v41 }
 0x1ae   : > { %v361_v42 = vpop.f32.mrf.mxu0 }
 0x1af PF: > { %s15_s20 = sadd.s32 1, %s545_s20   ;;  %s643_s18 = smov %s541_s19 }
 0x1b0   : > { %p12_p5 = scmp.ge.s32.totalorder %s15_s20, 4   ;;  %s644_s19 = smov %s646_s21 }
 0x1b2   :  { %14 = sbr.rel (!%p12_p5) target bundleno = 2 (0x2), region = 80 }

// kernel: clip_model_super_forward.15
= control target key start
LH: loop header
LB: loop body
LE: loop exit
PB: predicated region body
PF: predicated region fallthrough
CT: control target
= control target key end

     0   :  { %s321_s12 = smov 0   ;;  %s353_s0 = inlined_call_operand.vmem [shape: bf16[2,5,32], index: 0, kind: input, shape index: {}]   ;;  %s354_s1 = inlined_call_operand.vmem [shape: f32[1,32], index: 1, kind: input, shape index: {}]   ;;  %s355_s2 = inlined_call_operand.vmem [shape: f32[1,32], index: 2, kind: input, shape index: {}]   ;;  %s356_s3 = inlined_call_operand.vmem [shape: bf16[2,5,32], index: 3, kind: output, shape index: {}]  }
   0x1 LB: > { %s268_s13 = sadd.s32 4294967295, %s298_s12   ;;  %p272_p0 = scmp.ge.s32.totalorder %s298_s12, 1  ;;  %s298_s12 = sphi %s321_s12, %s13_s12  }
   0x2   : > { %p136_p1 = scmp.lt.s32.totalorder %s298_s12, 3 }
   0x4   : > { %p137_p2 = pnand %p272_p0, %p136_p1 }
   0x5   : > { %p158_p3 = scmp.lt.s32.totalorder (!%p137_p2), %s268_s13, 1 }
   0x6   : > { %140 = sbr.rel (%p137_p2) target bundleno = 289 (0x121), region = 32 }
   0xb   : > { %s358_s13 = smov (!%p158_p3, %s268_s13), 1  ;;  %vm168_vm0 = vcmask 258048   ;;  %v300_v3 = vmov 32.0   ;;  %v286_v24 = vld [vmem:[%s354_s1] ss:$0 sm:$0xff]  ;;  %vm209_vm5 = vcmask 256000  }
   0xc   : > { %s273_s14 = sshll.u32 %s358_s13, 2  ;;  %288 = vrcp.f32 %v300_v3  ;;  %v287_v26 = vld [vmem:[%s355_s2] ss:$0 sm:$0xff]  ;;  %vm210_vm6 = vsmask.f32 2304 }
   0xd   : > { %s161_s17 = scalar_lea.vmem %s353_s0, %s273_s14  ;;  %s165_s24 = scalar_lea.vmem %s356_s3, %s273_s14  ;;  %vm211_vm7 = vmand %vm209_vm5, %vm210_vm6 }
   0xe   : > { %v166_v0 = vld [vmem:[%s161_s17] sm:$0x7] }
   0xf   : > { %v167_v1 = vunpack.c.l.bf16 %v166_v0  ;;  %v212_v30 = vld [vmem:[%s165_s24] sm:$0x7] }
  0x11   : > { %v169_v2 = vsel %vm168_vm0, %v167_v1, 0.0 }
  0x12   : > { %170 = vadd.xlane.f32.xlu0 %v169_v2  ;;  %v289_v4 = vpop.eup %288 }
  0x13   : > { %v173_v5 = vmul.f32 32.0, %v289_v4  ;;  %vm177_vm1 = vweird.f32 %v289_v4 }
  0x15   : > { %v174_v6 = vsub.f32 1.0, %v173_v5 }
  0x17   : > { %v175_v7 = vmul.f32 %v289_v4, %v174_v6 }
  0x19   : > { %v176_v8 = vadd.f32 %v289_v4, %v175_v7 }
  0x1b   : > { %v178_v9 = vsel %vm177_vm1, %v289_v4, %v176_v8 }
  0x85   : > { %v171_v10 = vpop.xlane.xlu0 %170 }
  0x86   : > { %v179_v11 = vmul.f32 %v178_v9, %v171_v10 }
  0x88   : > { %v180_v12 = vsub.f32 %v167_v1, %v179_v11 }
  0x8a   : > { %v181_v13 = vmul.f32 %v180_v12, %v180_v12 }
  0x8c   : > { %v182_v14 = vsel %vm168_vm0, %v181_v13, 0.0 }
  0x8d   : > { %183 = vadd.xlane.f32.xlu0 %v182_v14 }
 0x100   : > { %v184_v15 = vpop.xlane.xlu0 %183 }
 0x101   : > { %v185_v16 = vmul.f32 %v184_v15, %v178_v9 }
 0x103   : > { %v186_v17 = vadd.f32 1e-05, %v185_v16 }
 0x105   : > { %290 = vrsqrt.f32 %v186_v17  ;;  %vm193_vm3 = vweird.f32 %v186_v17 }
 0x10b   : > { %v291_v18 = vpop.eup %290 }
 0x10c   : > { %v188_v19 = vmul.f32 %v291_v18, %v186_v17  ;;  %vm194_vm2 = vweird.f32 %v291_v18 }
 0x10d   : > { %vm195_vm4 = vmor %vm193_vm3, %vm194_vm2 }
 0x10e   : > { %v189_v20 = vmul.f32 %v291_v18, %v188_v19 }
 0x110   : > { %v190_v21 = vmul.f32 0.5, %v189_v20 }
 0x112   : > { %v191_v22 = vsub.f32 1.5, %v190_v21 }
 0x114   : > { %v192_v23 = vmul.f32 %v291_v18, %v191_v22 }
 0x116   : > { %v196_v25 = vsel %vm195_vm4, %v291_v18, %v192_v23 }
 0x117   : > { %v197_v27 = vmul.f32 %v196_v25, %v180_v12 }
 0x119   : > { %v202_v28 = vmul.f32 %v286_v24, %v197_v27 }
 0x11b   : > { %v207_v29 = vadd.f32 %v287_v26, %v202_v28 }
 0x11d   : > { %v208_v31 = vpack.c.bf16 %v207_v29, %v207_v29 }
 0x11f   : > { %v213_v32 = vsel %vm211_vm7, %v208_v31, %v212_v30 }
 0x120   : > { %214 = vst [vmem:[%s165_s24] sm:$0x7] %v213_v32 }
 0x121 PF: > { %s13_s12 = sadd.s32 1, %s298_s12  }
 0x122   : > { %p10_p4 = scmp.ge.s32.totalorder %s13_s12, 4  }
 0x124   :  { %12 = sbr.rel (!%p10_p4) target bundleno = 1 (0x1), region = 62 }

// kernel: clip_model_super_forward.14
= control target key start
LH: loop header
LB: loop body
LE: loop exit
PB: predicated region body
PF: predicated region fallthrough
CT: control target
= control target key end

     0   :  { %vm112_vm0 = vcmask 523264   ;;  %vm143_vm1 = vcmask 257024   ;;  %s270_s1 = inlined_call_operand.vmem [shape: bf16[192,32], index: 1, kind: input, shape index: {}]   ;;  %s271_s0 = inlined_call_operand.vmem [shape: f32[8,192], index: 0, kind: input, shape index: {}]   ;;  %s272_s2 = inlined_call_operand.vmem [shape: bf16[8,32], index: 2, kind: output, shape index: {}]  }
   0x1   :  { %v205_v0 = vld [vmem:[%s270_s1 + $0x38] sm:$0xff]  ;;  %v204_v2 = vld [vmem:[%s270_s1 + $0x30] sm:$0xff]  ;;  %v203_v4 = vld [vmem:[%s270_s1 + $0x28] sm:$0xff] }
   0x2   :  { %v209_v1 = vld [vmem:[%s270_s1 + $0x58] sm:$0xff]  ;;  %116 = vmatpush.bf16.msra.mxu0 %v205_v0  ;;  %v208_v3 = vld [vmem:[%s270_s1 + $0x50] sm:$0xff]  ;;  %v207_v5 = vld [vmem:[%s270_s1 + $0x48] sm:$0xff] }
   0x3   :  { %133 = vmatpush.bf16.msra.mxu1 %v209_v1  ;;  %v202_v6 = vld [vmem:[%s270_s1 + $0x20] sm:$0xff]  ;;  %v13_v8 = vld [vmem:[%s271_s0 + $0x8] sm:$0xff]  ;;  %v201_v9 = vld [vmem:[%s270_s1 + $0x18] sm:$0xff] }
   0x4   :  { %v206_v7 = vld [vmem:[%s270_s1 + $0x40] sm:$0xff]  ;;  %v15_v10 = vpack.c.bf16 %v13_v8, %v13_v8  ;;  %v200_v11 = vld [vmem:[%s270_s1 + $0x10] sm:$0xff]  ;;  %v199_v12 = vld [vmem:[%s270_s1 + $0x8] sm:$0xff] }
   0x5   :  { %v198_v13 = vld [vmem:[%s270_s1] sm:$0xff] }
   0x6   :  { %117 = vmatpush.bf16.msra.mxu0 %v204_v2  ;;  %v12_v14 = vld [vmem:[%s271_s0] sm:$0xff] }
   0x7   :  { %134 = vmatpush.bf16.msra.mxu1 %v208_v3  ;;  %v14_v15 = vpack.c.bf16 %v12_v14, %v12_v14 }
   0xa   :  { %118 = vmatpush.bf16.msra.mxu0 %v203_v4 }
   0xb   :  { %135 = vmatpush.bf16.msra.mxu1 %v207_v5 }
   0xe   :  { %119 = vmatpush.bf16.msra.mxu0 %v202_v6 }
   0xf   :  { %136 = vmatpush.bf16.msra.mxu1 %v206_v7 }
  0x12   :  { %120 = vmatpush.bf16.msra.mxu0 %v201_v9  ;;  %197 = vmatmul.msk.bf16.vlgmr.msra.gmra.mxu1 %vm112_vm0, %v15_v10 }
  0x16   :  { %121 = vmatpush.bf16.msra.mxu0 %v200_v11 }
  0x1a   :  { %122 = vmatpush.bf16.msra.mxu0 %v199_v12 }
  0x1e   :  { %123 = vmatpush.bf16.msra.mxu0 %v198_v13 }
  0x21   :  { %124 = vmatmul.bf16.vlgmr.msra.gmra.mxu0 %v14_v15 }
  0x8f   :  { %v138_v16 = vpop.f32.mrf.mxu1 }
  0x97   :  { %v140_v17 = vpop.f32.mrf.mxu1 }
  0x9e   :  { %v125_v18 = vpop.f32.mrf.mxu0 }
  0x9f   :  { %v139_v19 = vadd.f32 %v138_v16, %v125_v18 }
  0xa1   :  { %v142_v20 = vpack.c.bf16 %v139_v19, %v139_v19 }
  0xa3   :  { %144 = vst.msk [vmem:[%s272_s2] sm:$0xf] %vm143_vm1, %v142_v20 }
  0xa6   :  { %v127_v21 = vpop.f32.mrf.mxu0 }

// kernel: clip_model_super_forward.17
= control target key start
LH: loop header
LB: loop body
LE: loop exit
PB: predicated region body
PF: predicated region fallthrough
CT: control target
= control target key end

     0   :  { %s541_s6 = smov 0   ;;  %s610_s0 = inlined_call_operand.vmem [shape: bf16[2,5,96], index: 0, kind: input, shape index: {}]   ;;  %s611_s1 = inlined_call_operand.vmem [shape: bf16[2,5,32], index: 1, kind: output, shape index: {}]  }
   0x1 LB: > { %s452_s7 = sadd.s32 4294967295, %s514_s6   ;;  %p456_p0 = scmp.ge.s32.totalorder %s514_s6, 1  ;;  %s514_s6 = sphi %s541_s6, %s11_s6  }
   0x2   : > { %p86_p1 = scmp.lt.s32.totalorder %s514_s6, 3 }
   0x4   : > { %p87_p2 = pnand %p456_p0, %p86_p1 }
   0x5   : > { %p104_p3 = scmp.lt.s32.totalorder (!%p87_p2), %s452_s7, 1  ;;  %s516_s12 = smov (!%p87_p2), 96  }
   0x6   : > { %90 = sbr.rel (%p87_p2) target bundleno = 1199 (0x4af), region = 24  ;;  %s517_s13 = smov (!%p87_p2), 120  }
   0x7   : > { %s518_s14 = smov (!%p87_p2), 64   ;;  %s519_s15 = smov (!%p87_p2), 80  }
   0x8   : > { %s520_s16 = smov (!%p87_p2), 112   ;;  %s521_s17 = smov (!%p87_p2), 88  }
   0x9   : > { %s522_s18 = smov (!%p87_p2), 72   ;;  %s523_s19 = smov (!%p87_p2), 104  }
   0xa   : > { %s524_s20 = smov (!%p87_p2), 56   ;;  %s526_s21 = smov (!%p87_p2), 40  }
   0xb   : > { %s613_s7 = smov (!%p104_p3, %s452_s7), 1  ;;  %vm119_vm0 = vcmask 64512   ;;  %vm140_vm1 = vcmask 36864   ;;  %vm159_vm2 = vcmask 1041408   ;;  %vm160_vm3 = vcmask 1042432   ;;  %s527_s25 = smov 48  }
   0xc   : > { %s457_s8 = sshll.u32 %s613_s7, 2  ;;  %v525_v36 = vmov 65535   ;;  %vm155_vm4 = vcmask 39936   ;;  %vm180_vm5 = vcmask 59392   ;;  %vm181_vm6 = vsmask.f32 2304 }
   0xd   : > { %s107_s11 = scalar_lea.vmem %s610_s0, %s457_s8  ;;  %v161_v37 = vsel %vm159_vm2, 4294967295, %v525_v36  ;;  %s583_s24 = scalar_lea.vmem %s611_s1, %s457_s8  ;;  %vm182_vm7 = vmand %vm180_vm5, %vm181_vm6  ;;  %vm252_vm8 = vcmask 124992   ;;  %vm323_vm10 = vcmask 190592   ;;  %vm394_vm12 = vcmask 256192  }
   0xe   : > { %v113_v0 = vld [vmem:[%s107_s11] sm:$0x7]  ;;  %v570_v38 = vsel %vm160_vm3, %v161_v37, 0  ;;  %s528_s26 = smov 8   ;;  %vm253_vm9 = vmand %vm252_vm8, %vm181_vm6  ;;  %s529_s27 = smov 16  }
   0xf   : > { %v115_v1 = vunpack.c.l.b16 %v113_v0  ;;  %v186_v3 = vld [vmem:[%s107_s11] sm:$0x7]  ;;  %s530_s28 = smov 24   ;;  %vm324_vm11 = vmand %vm323_vm10, %vm181_vm6 }
  0x10   : > { %v188_v4 = vunpack.c.l.b16 %v186_v3  ;;  %v257_v6 = vld [vmem:[%s107_s11] sm:$0x7]  ;;  %vm395_vm13 = vmand %vm394_vm12, %vm181_vm6 }
  0x11   : > { %v116_v2 = vpack.c.b16 %v115_v1, %v115_v1  ;;  %v259_v7 = vunpack.c.l.b16 %v257_v6  ;;  %v328_v11 = vld [vmem:[%s107_s11] sm:$0x7] }
  0x12   : > { %v189_v5 = vpack.c.b16 %v188_v4, %v188_v4  ;;  %v330_v12 = vunpack.c.l.b16 %v328_v11  ;;  %v183_v59 = vld [vmem:[%s583_s24] sm:$0x7] }
  0x13   : > { %117 = vrot.lane.b32.xlu0 %v116_v2, %s516_s12  ;;  %v557_v8 = vpack.c.b16 %v259_v7, %v259_v7 }
  0x14   : > { %190 = vrot.lane.b32.xlu2 %v189_v5, %s517_s13  ;;  %v331_v13 = vpack.c.b16 %v330_v12, %v330_v12  ;;  %192 = vrot.lane.b32.xlu1 %v189_v5, %s521_s17 }
  0x1c   : > { %153 = vrot.lane.b32.xlu2 %v116_v2, %s518_s14 }
  0x24   : > { %263 = vrot.lane.b32.xlu2 %v557_v8, %s519_s15 }
  0x2c   : > { %261 = vrot.lane.b32.xlu2 %v557_v8, %s520_s16 }
  0x34   : > { %334 = vrot.lane.b32.xlu2 %v331_v13, %s522_s18 }
  0x3c   : > { %332 = vrot.lane.b32.xlu2 %v331_v13, %s523_s19 }
  0x6e   : > { %v191_v14 = vpop.permute.xlu2 %190 }
  0x76   : > { %v154_v15 = vpop.permute.xlu2 %153 }
  0x77   : > { %v164_v39 = vand.u32 %v570_v38, %v154_v15 }
  0x79   : > { %173 = vmatpush.bf16.msra.mxu1 %v164_v39 }
  0x7e   : > { %v264_v16 = vpop.permute.xlu2 %263 }
  0x7f   : > { %v269_v40 = vsel %vm119_vm0, %v264_v16, 0 }
  0x80   : > { %278 = vmatpush.bf16.xpose.msrb.mxu1 %v269_v40 }
  0x85   : > { %v118_v9 = vpop.permute.xlu0 %117 }
  0x86   : > { %v124_v10 = vsel %vm119_vm0, %v118_v9, 0  ;;  %v262_v17 = vpop.permute.xlu2 %261  ;;  %v193_v25 = vpop.permute.xlu1 %192 }
  0x87   : > { %133 = vmatpush.bf16.xpose.msra.mxu0 %v124_v10  ;;  %v198_v26 = vsel %vm119_vm0, %v193_v25, 0 }
  0x88   : > { %207 = vmatpush.bf16.xpose.msra.mxu2 %v198_v26 }
  0x8e   : > { %459 = vmatmul.msk.bf16.vlgmr.msra.gmra.mxu0 %vm119_vm0, %v113_v0  ;;  %v335_v21 = vpop.permute.xlu2 %334 }
  0x8f   : > { %v340_v23 = vsel %vm119_vm0, %v335_v21, 0  ;;  %461 = vmatmul.msk.bf16.vlgmr.msra.gmra.mxu2 %vm119_vm0, %v191_v14 }
  0x90   : > { %349 = vmatpush.bf16.xpose.msrb.mxu0 %v340_v23 }
  0x96   : > { %v333_v24 = vpop.permute.xlu2 %332 }
  0x9e   : > { %465 = vmatmul.msk.bf16.vlgmr.msrb.gmra.mxu0 %vm119_vm0, %v333_v24 }
 0x10b   : > { %v135_v18 = vpop.f32.mrf.mxu0 }
 0x10c   : > { %v139_v19 = vmul.f32 0.35355338, %v135_v18 }
 0x10e   : > { %v141_v20 = vsel %vm140_vm1, %v139_v19, -inf }
 0x10f   : > { %142 = vmax.xlane.f32.xlu0 %v141_v20 }
 0x112   : > { %v209_v41 = vpop.f32.mrf.mxu2 }
 0x113   : > { %v137_v22 = vpop.f32.mrf.mxu0  ;;  %v213_v42 = vmul.f32 0.35355338, %v209_v41 }
 0x115   : > { %v214_v43 = vsel %vm140_vm1, %v213_v42, -inf }
 0x116   : > { %215 = vmax.xlane.f32.xlu2 %v214_v43 }
 0x11a   : > { %v211_v44 = vpop.f32.mrf.mxu2 }
 0x11b   : > { %v351_v32 = vpop.f32.mrf.mxu0 }
 0x11c   : > { %v355_v33 = vmul.f32 0.35355338, %v351_v32 }
 0x11e   : > { %v356_v34 = vsel %vm140_vm1, %v355_v33, -inf }
 0x123   : > { %v353_v35 = vpop.f32.mrf.mxu0 }
 0x12e   : > { %368 = vrot.lane.b32.xlu2 %v331_v13, %s526_s21 }
 0x182   : > { %v143_v27 = vpop.xlane.xlu0 %142 }
 0x183   : > { %v144_v28 = vsub.f32 %v139_v19, %v143_v27 }
 0x185   : > { %v145_v29 = vmul.f32 1.442695, %v144_v28 }
 0x187   : > { %492 = vpow2.f32 %v145_v29 }
 0x189   : > { %v216_v54 = vpop.xlane.xlu2 %215 }
 0x18a   : > { %v217_v0 = vsub.f32 %v213_v42, %v216_v54 }
 0x18c   : > { %v218_v3 = vmul.f32 1.442695, %v217_v0 }
 0x18d   : > { %v493_v30 = vpop.eup %492 }
 0x18e   : > { %v147_v31 = vsel %vm140_vm1, %v493_v30, 0.0 }
 0x18f   : > { %148 = vadd.xlane.f32.xlu1 %v147_v31 }
 0x191   : > { %v369_v56 = vpop.permute.xlu2 %368 }
 0x192   : > { %v374_v57 = vand.u32 %v369_v56, %v570_v38 }
 0x194   : > { %383 = vmatpush.bf16.msrb.mxu2 %v374_v57 }
 0x197   : > { %357 = vmax.xlane.f32.xlu1 %v356_v34 }
 0x1b0   : > { %226 = vrot.lane.b32.xlu1 %v189_v5, %s524_s20 }
 0x202   : > { %v149_v45 = vpop.xlane.xlu1 %148 }
 0x203   : > { %494 = vrcp.f32 %v149_v45 }
 0x209   : > { %v495_v46 = vpop.eup %494 }
 0x20a   : > { %v151_v47 = vmul.f32 %v495_v46, %v493_v30  ;;  %v358_v49 = vpop.xlane.xlu1 %357 }
 0x20b   : > { %v359_v50 = vsub.f32 %v355_v33, %v358_v49 }
 0x20c   : > { %v152_v48 = vpack.c.bf16 %v151_v47, %v151_v47 }
 0x20d   : > { %v360_v51 = vmul.f32 1.442695, %v359_v50 }
 0x20e   : > { %460 = vmatmul.msk.bf16.vlgmr.msra.gmra.mxu1 %vm155_vm4, %v152_v48 }
 0x20f   : > { %496 = vpow2.f32 %v360_v51 }
 0x215   : > { %v497_v52 = vpop.eup %496 }
 0x216   : > { %v362_v53 = vsel %vm140_vm1, %v497_v52, 0.0 }
 0x217   : > { %363 = vadd.xlane.f32.xlu1 %v362_v53 }
 0x21e   : > { %463 = vmatmul.msk.bf16.vlgmr.msrb.gmra.mxu1 %vm119_vm0, %v262_v17 }
 0x222   : > { %v227_v55 = vpop.permute.xlu1 %226 }
 0x223   : > { %v232_v12 = vand.u32 %v227_v55, %v570_v38 }
 0x225   : > { %241 = vmatpush.bf16.msra.mxu3 %v232_v12 }
 0x28a   : > { %v364_v62 = vpop.xlane.xlu1 %363 }
 0x28b   : > { %v175_v58 = vpop.f32.mrf.mxu1  ;;  %498 = vrcp.f32 %v364_v62 }
 0x28c   : > { %v179_v60 = vpack.c.bf16 %v175_v58, %v175_v58  ;;  %500 = vpow2.f32 %v218_v3 }
 0x28e   : > { %v184_v61 = vsel %vm182_vm7, %v179_v60, %v183_v59 }
 0x28f   : > { %185 = vst [vmem:[%s583_s24] sm:$0x7] %v184_v61 }
 0x291   : > { %v499_v1 = vpop.eup %498 }
 0x292   : > { %v366_v2 = vmul.f32 %v499_v1, %v497_v52  ;;  %v501_v9 = vpop.eup %500 }
 0x293   : > { %v177_v63 = vpop.f32.mrf.mxu1  ;;  %v220_v11 = vsel %vm140_vm1, %v501_v9, 0.0 }
 0x294   : > { %v367_v4 = vpack.c.bf16 %v366_v2, %v366_v2 }
 0x296   : > { %466 = vmatmul.msk.bf16.vlgmr.msrb.gmra.mxu2 %vm155_vm4, %v367_v4 }
 0x29b   : > { %v280_v5 = vpop.f32.mrf.mxu1 }
 0x29c   : > { %v284_v6 = vmul.f32 0.35355338, %v280_v5 }
 0x29e   : > { %v285_v7 = vsel %vm140_vm1, %v284_v6, -inf }
 0x29f   : > { %286 = vmax.xlane.f32.xlu0 %v285_v7 }
 0x2a3   : > { %v282_v10 = vpop.f32.mrf.mxu1 }
 0x2a7   : > { %221 = vadd.xlane.f32.xlu0 %v220_v11 }
 0x312   : > { %v287_v13 = vpop.xlane.xlu0 %286 }
 0x313   : > { %v288_v14 = vsub.f32 %v284_v6, %v287_v13 }
 0x315   : > { %v289_v15 = vmul.f32 1.442695, %v288_v14 }
 0x317   : > { %502 = vpow2.f32 %v289_v15 }
 0x319   : > { %v385_v19 = vpop.f32.mrf.mxu2 }
 0x31a   : > { %v222_v16 = vpop.xlane.xlu0 %221 }
 0x31b   : > { %504 = vrcp.f32 %v222_v16 }
 0x31d   : > { %v503_v17 = vpop.eup %502 }
 0x31e   : > { %v291_v18 = vsel %vm140_vm1, %v503_v17, 0.0 }
 0x31f   : > { %292 = vadd.xlane.f32.xlu0 %v291_v18 }
 0x321   : > { %v505_v20 = vpop.eup %504  ;;  %v387_v23 = vpop.f32.mrf.mxu2 }
 0x322   : > { %v224_v21 = vmul.f32 %v505_v20, %v501_v9 }
 0x324   : > { %v225_v22 = vpack.c.bf16 %v224_v21, %v224_v21 }
 0x326   : > { %462 = vmatmul.msk.bf16.vlgmr.msra.gmra.mxu3 %vm155_vm4, %v225_v22 }
 0x333   : > { %297 = vrot.lane.b32.xlu0 %v557_v8, %s527_s25  ;;  %v254_v8 = vld [vmem:[%s583_s24] sm:$0x7] }
 0x392   : > { %v293_v24 = vpop.xlane.xlu0 %292 }
 0x393   : > { %506 = vrcp.f32 %v293_v24 }
 0x399   : > { %v507_v25 = vpop.eup %506 }
 0x39a   : > { %v295_v26 = vmul.f32 %v507_v25, %v503_v17 }
 0x39c   : > { %v296_v30 = vpack.c.bf16 %v295_v26, %v295_v26 }
 0x3a5   : > { %v298_v27 = vpop.permute.xlu0 %297 }
 0x3a6   : > { %v303_v28 = vand.u32 %v298_v27, %v570_v38  ;;  %v389_v38 = vpack.c.bf16 %v385_v19, %v385_v19 }
 0x3a8   : > { %312 = vmatpush.bf16.msrb.mxu3 %v303_v28 }
 0x3a9   : > { %v243_v29 = vpop.f32.mrf.mxu3 }
 0x3aa   : > { %v247_v31 = vpack.c.bf16 %v243_v29, %v243_v29 }
 0x3ab   : > { %464 = vmatmul.msk.bf16.vlgmr.msrb.gmra.mxu3 %vm155_vm4, %v296_v30 }
 0x3ac   : > { %249 = vrot.lane.b32.xlu0 %v247_v31, %s528_s26 }
 0x3b1   : > { %v245_v32 = vpop.f32.mrf.mxu3 }
 0x41e   : > { %v250_v33 = vpop.permute.xlu0 %249 }
 0x41f   : > { %v255_v34 = vsel %vm253_vm9, %v250_v33, %v254_v8 }
 0x420   : > { %256 = vst [vmem:[%s583_s24] sm:$0x7] %v255_v34 }
 0x427   : > { %v325_v39 = vld [vmem:[%s583_s24] sm:$0x7] }
 0x42e   : > { %v314_v35 = vpop.f32.mrf.mxu3 }
 0x42f   : > { %v318_v36 = vpack.c.bf16 %v314_v35, %v314_v35 }
 0x431   : > { %320 = vrot.lane.b32.xlu0 %v318_v36, %s529_s27 }
 0x436   : > { %v316_v37 = vpop.f32.mrf.mxu3 }
 0x439   : > { %391 = vrot.lane.b32.xlu0 %v389_v38, %s530_s28 }
 0x4a3   : > { %v321_v40 = vpop.permute.xlu0 %320 }
 0x4a4   : > { %v326_v41 = vsel %vm324_vm11, %v321_v40, %v325_v39 }
 0x4a5   : > { %327 = vst [vmem:[%s583_s24] sm:$0x7] %v326_v41 }
 0x4ab   : > { %v392_v42 = vpop.permute.xlu0 %391 }
 0x4ac   : > { %v396_v43 = vld [vmem:[%s583_s24] sm:$0x7] }
 0x4ad   : > { %v397_v44 = vsel %vm395_vm13, %v392_v42, %v396_v43 }
 0x4ae   : > { %398 = vst [vmem:[%s583_s24] sm:$0x7] %v397_v44 }
 0x4af PF: > { %s11_s6 = sadd.s32 1, %s514_s6  }
 0x4b0   : > { %p8_p4 = scmp.ge.s32.totalorder %s11_s6, 4  }
 0x4b2   :  { %10 = sbr.rel (!%p8_p4) target bundleno = 1 (0x1), region = 54 }

// kernel: clip_model_super_forward.18
= control target key start
LH: loop header
LB: loop body
LE: loop exit
PB: predicated region body
PF: predicated region fallthrough
CT: control target
= control target key end

     0   :  { %s592_s15 = smov 0   ;;  %s594_s16 = smov 0   ;;  %s639_s0 = inlined_call_operand.vmem [shape: bf16[2,5,32], index: 0, kind: input, shape index: {}]   ;;  %s640_s1 = inlined_call_operand.vmem [shape: bf16[32,32], index: 1, kind: input, shape index: {}]   ;;  %s641_s2 = inlined_call_operand.vmem [shape: f32[1,32], index: 2, kind: input, shape index: {}]   ;;  %s642_s3 = inlined_call_operand.vmem [shape: bf16[2,5,32], index: 3, kind: input, shape index: {}]   ;;  %s643_s4 = inlined_call_operand.vmem [shape: bf16[2,5,32], index: 4, kind: output, shape index: {}]  }
   0x1   :  { %s596_s17 = smov 0  }
   0x2 LB: > { %s33_s18 = sadd.s32 1, %s560_s16  ;;  %p499_p0 = scmp.ge.s32.totalorder %s564_s17, 1  ;;  %s564_s17 = sphi %s596_s17, %s14_s17   ;;  %s560_s16 = sphi %s594_s16, %s645_s16   ;;  %s556_s15 = sphi %s592_s15, %s644_s15  }
   0x3   : > { %p35_p1 = scmp.ge.s32.totalorder %s33_s18, 2  ;;  %p225_p2 = scmp.lt.s32.totalorder %s564_s17, 3 }
   0x5   : > { %s647_s18 = smov (%p35_p1, %s33_s18), 0  ;;  %p226_p3 = pnand %p499_p0, %p225_p2 }
   0x6   : > { %p273_p4 = scmp.lt.s32.totalorder (!%p226_p3), %s556_s15, 1 }
   0x7   : > { %229 = sbr.rel (%p226_p3) target bundleno = 164 (0xa4), region = 36 }
   0xc   : > { %v515_v0 = vld [vmem:[%s640_s1 + $0x8] sm:$0xff]  ;;  %vm311_vm0 = vcmask 258048   ;;  %v566_v1 = vmov 0.0   ;;  %v514_v2 = vld [vmem:[%s640_s1] sm:$0xff]  ;;  %s649_s15 = smov (!%p273_p4, %s556_s15), 1  ;;  %vm331_vm1 = vcmask 261120  }
   0xd   : > { %312 = vst.msk [vmem:[#allocation2] sm:$0x1f] %vm311_vm0, %v566_v1  ;;  %341 = vmatpush.bf16.msra.mxu0 %v515_v0  ;;  %s500_s23 = sshll.u32 %s649_s15, 2  ;;  %v541_v8 = vld [vmem:[%s641_s2] ss:$0 sm:$0xff]  ;;  %vm364_vm2 = vcmask 256000  }
   0xe   : > { %s279_s26 = scalar_lea.vmem %s639_s0, %s500_s23  ;;  %s298_s29 = scalar_lea.vmem %s642_s3, %s500_s23  ;;  %vm365_vm3 = vsmask.f32 2304 }
   0xf   : > { %v314_v3 = vld [vmem:[%s279_s26] sm:$0x7]  ;;  %s305_s8 = scalar_lea.vmem %s643_s4, %s500_s23  ;;  %vm366_vm4 = vmand %vm364_vm2, %vm365_vm3 }
  0x10   : > { %v360_v7 = vld [vmem:[%s298_s29] sm:$0x7] }
  0x11   : > { %342 = vmatpush.bf16.msra.mxu0 %v514_v2  ;;  %v361_v10 = vunpack.c.l.bf16 %v360_v7  ;;  %v367_v14 = vld [vmem:[%s305_s8] sm:$0x7] }
  0x14   : > { %511 = vmatmul.msk.bf16.vlgmr.msra.gmra.mxu0 %vm331_vm1, %v314_v3  ;;  %v313_v4 = vld [vmem:[#allocation2] sm:$0x1f] }
  0x91   : > { %v344_v5 = vpop.f32.mrf.mxu0 }
  0x92   : > { %v348_v6 = vadd.f32 %v344_v5, %v313_v4 }
  0x94   : > { %350 = vst.msk [vmem:[#allocation2] sm:$0x1f] %vm311_vm0, %v348_v6 }
  0x99   : > { %v346_v9 = vpop.f32.mrf.mxu0 }
  0x9b   : > { %v354_v11 = vld [vmem:[#allocation2] sm:$0x1f] }
  0x9c   : > { %v359_v12 = vadd.f32 %v541_v8, %v354_v11 }
  0x9e   : > { %v362_v13 = vadd.f32 %v361_v10, %v359_v12 }
  0xa0   : > { %v363_v15 = vpack.c.bf16 %v362_v13, %v362_v13 }
  0xa2   : > { %v368_v16 = vsel %vm366_vm4, %v363_v15, %v367_v14 }
  0xa3   : > { %369 = vst [vmem:[%s305_s8] sm:$0x7] %v368_v16 }
  0xa4 PF: > { %s14_s17 = sadd.s32 1, %s564_s17   ;;  %s644_s15 = smov %s560_s16 }
  0xa5   : > { %p11_p5 = scmp.ge.s32.totalorder %s14_s17, 4   ;;  %s645_s16 = smov %s647_s18 }
  0xa7   :  { %13 = sbr.rel (!%p11_p5) target bundleno = 2 (0x2), region = 83 }

// kernel: clip_model_super_forward.19
= control target key start
LH: loop header
LB: loop body
LE: loop exit
PB: predicated region body
PF: predicated region fallthrough
CT: control target
= control target key end

     0   :  { %s604_s18 = smov 0   ;;  %s606_s19 = smov 0   ;;  %s663_s0 = inlined_call_operand.vmem [shape: bf16[2,5,32], index: 0, kind: input, shape index: {}]   ;;  %s664_s1 = inlined_call_operand.vmem [shape: f32[1,32], index: 1, kind: input, shape index: {}]   ;;  %s665_s2 = inlined_call_operand.vmem [shape: f32[1,32], index: 2, kind: input, shape index: {}]   ;;  %s666_s3 = inlined_call_operand.vmem [shape: bf16[32,128], index: 3, kind: input, shape index: {}]   ;;  %s667_s4 = inlined_call_operand.vmem [shape: f32[1,128], index: 4, kind: input, shape index: {}]   ;;  %s668_s5 = inlined_call_operand.vmem [shape: bf16[2,5,128], index: 5, kind: output, shape index: {}]  }
   0x1   :  { %s608_s20 = smov 0  }
   0x2 LB: > { %s27_s21 = sadd.s32 1, %s567_s19  ;;  %p496_p0 = scmp.ge.s32.totalorder %s571_s20, 1  ;;  %s571_s20 = sphi %s608_s20, %s15_s20   ;;  %s567_s19 = sphi %s606_s19, %s670_s19   ;;  %s563_s18 = sphi %s604_s18, %s669_s18  }
   0x3   : > { %p29_p1 = scmp.ge.s32.totalorder %s27_s21, 2  ;;  %p217_p2 = scmp.lt.s32.totalorder %s571_s20, 3 }
   0x5   : > { %s672_s21 = smov (%p29_p1, %s27_s21), 0  ;;  %p218_p3 = pnand %p496_p0, %p217_p2 }
   0x6   : > { %p253_p4 = scmp.lt.s32.totalorder (!%p218_p3), %s563_s18, 1 }
   0x7   : > { %221 = sbr.rel (%p218_p3) target bundleno = 461 (0x1cd), region = 40 }
   0xc   : > { %s674_s18 = smov (!%p253_p4, %s563_s18), 1  ;;  %vm278_vm0 = vcmask 258048   ;;  %v573_v3 = vmov 32.0   ;;  %v512_v15 = vld [vmem:[%s666_s3 + $0x8] sm:$0xff]  ;;  %v511_v18 = vld [vmem:[%s666_s3] sm:$0xff]  ;;  %vm319_vm5 = vcmask 256000  }
   0xd   : > { %s497_s22 = sshll.u32 %s674_s18, 2  ;;  %541 = vrcp.f32 %v573_v3  ;;  %356 = vmatpush.bf16.msra.mxu0 %v512_v15  ;;  %v538_v26 = vld [vmem:[%s664_s1] ss:$0 sm:$0xff]  ;;  %vm320_vm6 = vsmask.f32 2304  ;;  %vm346_vm8 = vcmask 261120  }
   0xe   : > { %s256_s25 = scalar_lea.vmem %s663_s0, %s497_s22  ;;  %v539_v28 = vld [vmem:[%s665_s2] ss:$0 sm:$0xff]  ;;  %vm321_vm7 = vmand %vm319_vm5, %vm320_vm6  ;;  %s270_s13 = scalar_lea.vmem %s668_s5, %s497_s22  ;;  %vm385_vm13 = vcmask 1042432  }
   0xf   : > { %v276_v0 = vld [vmem:[%s256_s25] sm:$0x7]  ;;  %vm387_vm14 = vmand %vm385_vm13, %vm320_vm6 }
  0x10   : > { %v277_v1 = vunpack.c.l.bf16 %v276_v0  ;;  %v322_v32 = vld [vmem:[#allocation2] sm:$0x7] }
  0x11   : > { %357 = vmatpush.bf16.msra.mxu0 %v511_v18  ;;  %v540_v36 = vld [vmem:[%s667_s4] ss:$0 sm:$0xff] }
  0x12   : > { %v279_v2 = vsel %vm278_vm0, %v277_v1, 0.0  ;;  %v388_v55 = vld [vmem:[%s270_s13] sm:$0x7] }
  0x13   : > { %280 = vadd.xlane.f32.xlu0 %v279_v2  ;;  %v542_v4 = vpop.eup %541 }
  0x14   : > { %v283_v5 = vmul.f32 32.0, %v542_v4  ;;  %vm287_vm1 = vweird.f32 %v542_v4 }
  0x16   : > { %v284_v6 = vsub.f32 1.0, %v283_v5 }
  0x18   : > { %v285_v7 = vmul.f32 %v542_v4, %v284_v6 }
  0x1a   : > { %v286_v8 = vadd.f32 %v542_v4, %v285_v7 }
  0x1c   : > { %v288_v9 = vsel %vm287_vm1, %v542_v4, %v286_v8 }
  0x86   : > { %v281_v10 = vpop.xlane.xlu0 %280 }
  0x87   : > { %v289_v11 = vmul.f32 %v288_v9, %v281_v10 }
  0x89   : > { %v290_v12 = vsub.f32 %v277_v1, %v289_v11 }
  0x8b   : > { %v291_v13 = vmul.f32 %v290_v12, %v290_v12 }
  0x8d   : > { %v292_v14 = vsel %vm278_vm0, %v291_v13, 0.0 }
  0x8e   : > { %293 = vadd.xlane.f32.xlu0 %v292_v14 }
 0x101   : > { %v294_v16 = vpop.xlane.xlu0 %293 }
 0x102   : > { %v295_v17 = vmul.f32 %v294_v16, %v288_v9 }
 0x104   : > { %v296_v19 = vadd.f32 1e-05, %v295_v17 }
 0x106   : > { %543 = vrsqrt.f32 %v296_v19  ;;  %vm303_vm3 = vweird.f32 %v296_v19 }
 0x10c   : > { %v544_v20 = vpop.eup %543 }
 0x10d   : > { %v298_v21 = vmul.f32 %v544_v20, %v296_v19  ;;  %vm304_vm2 = vweird.f32 %v544_v20 }
 0x10e   : > { %vm305_vm4 = vmor %vm303_vm3, %vm304_vm2 }
 0x10f   : > { %v299_v22 = vmul.f32 %v544_v20, %v298_v21 }
 0x111   : > { %v300_v23 = vmul.f32 0.5, %v299_v22 }
 0x113   : > { %v301_v24 = vsub.f32 1.5, %v300_v23 }
 0x115   : > { %v302_v25 = vmul.f32 %v544_v20, %v301_v24 }
 0x117   : > { %v306_v27 = vsel %vm305_vm4, %v544_v20, %v302_v25 }
 0x118   : > { %v307_v29 = vmul.f32 %v306_v27, %v290_v12 }
 0x11a   : > { %v312_v30 = vmul.f32 %v538_v26, %v307_v29 }
 0x11c   : > { %v317_v31 = vadd.f32 %v539_v28, %v312_v30 }
 0x11e   : > { %v318_v33 = vpack.c.bf16 %v317_v31, %v317_v31 }
 0x120   : > { %v323_v34 = vsel %vm321_vm7, %v318_v33, %v322_v32 }
 0x121   : > { %324 = vst [vmem:[#allocation2] sm:$0x7] %v323_v34 }
 0x128   : > { %v325_v35 = vld [vmem:[#allocation2] sm:$0x7] }
 0x129   : > { %507 = vmatmul.msk.bf16.vlgmr.msra.gmra.mxu0 %vm346_vm8, %v325_v35 }
 0x1a6   : > { %v359_v37 = vpop.f32.mrf.mxu0 }
 0x1a7   : > { %v360_v38 = vadd.f32 %v540_v36, %v359_v37 }
 0x1a9   : > { %v508_v39 = vmul.f32 -1.702, %v360_v38 }
 0x1ab   : > { %v365_v40 = vmul.f32 1.442695, %v508_v39 }
 0x1ad   : > { %545 = vpow2.f32 %v365_v40 }
 0x1ae   : > { %v361_v41 = vpop.f32.mrf.mxu0 }
 0x1b3   : > { %v546_v42 = vpop.eup %545 }
 0x1b4   : > { %v367_v43 = vadd.f32 1.0, %v546_v42 }
 0x1b6   : > { %547 = vrcp.f32 %v367_v43  ;;  %v379_v47 = vand.u32 2147483648, %v367_v43  ;;  %v377_v49 = vand.u32 2147483647, %v367_v43  ;;  %vm373_vm10 = vweird.f32 %v367_v43 }
 0x1b8   : > { %v380_v51 = vor.u32 1.1754944e-38, %v379_v47  ;;  %vm378_vm12 = vcmp.eq.f32.partialorder %v377_v49, 8.507059e+37 }
 0x1bc   : > { %v548_v44 = vpop.eup %547 }
 0x1bd   : > { %v369_v45 = vmul.f32 %v548_v44, %v367_v43  ;;  %vm374_vm9 = vweird.f32 %v548_v44 }
 0x1be   : > { %vm375_vm11 = vmor %vm373_vm10, %vm374_vm9 }
 0x1bf   : > { %v370_v46 = vsub.f32 1.0, %v369_v45 }
 0x1c1   : > { %v371_v48 = vmul.f32 %v548_v44, %v370_v46 }
 0x1c3   : > { %v372_v50 = vadd.f32 %v548_v44, %v371_v48 }
 0x1c5   : > { %v376_v52 = vsel %vm375_vm11, %v548_v44, %v372_v50 }
 0x1c6   : > { %v381_v53 = vsel %vm378_vm12, %v380_v51, %v376_v52 }
 0x1c7   : > { %v383_v54 = vmul.f32 %v381_v53, %v360_v38 }
 0x1c9   : > { %v384_v56 = vpack.c.bf16 %v383_v54, %v383_v54 }
 0x1cb   : > { %v389_v57 = vsel %vm387_vm14, %v384_v56, %v388_v55 }
 0x1cc   : > { %390 = vst [vmem:[%s270_s13] sm:$0x7] %v389_v57 }
 0x1cd PF: > { %s15_s20 = sadd.s32 1, %s571_s20   ;;  %s669_s18 = smov %s567_s19 }
 0x1ce   : > { %p12_p5 = scmp.ge.s32.totalorder %s15_s20, 4   ;;  %s670_s19 = smov %s672_s21 }
 0x1d0   :  { %14 = sbr.rel (!%p12_p5) target bundleno = 2 (0x2), region = 80 }

// kernel: clip_model_super_forward.20
= control target key start
LH: loop header
LB: loop body
LE: loop exit
PB: predicated region body
PF: predicated region fallthrough
CT: control target
= control target key end

     0   :  { %s664_s15 = smov 0   ;;  %s666_s16 = smov 0   ;;  %s729_s0 = inlined_call_operand.vmem [shape: bf16[2,5,128], index: 0, kind: input, shape index: {}]   ;;  %s730_s1 = inlined_call_operand.vmem [shape: bf16[128,32], index: 1, kind: input, shape index: {}]   ;;  %s731_s2 = inlined_call_operand.vmem [shape: f32[1,32], index: 2, kind: input, shape index: {}]   ;;  %s732_s3 = inlined_call_operand.vmem [shape: bf16[2,5,32], index: 3, kind: input, shape index: {}]   ;;  %s733_s4 = inlined_call_operand.vmem [shape: bf16[2,5,32], index: 4, kind: output, shape index: {}]  }
   0x1   :  { %s668_s17 = smov 0  }
   0x2 LB: > { %s33_s18 = sadd.s32 1, %s632_s16  ;;  %p542_p0 = scmp.ge.s32.totalorder %s636_s17, 1  ;;  %s636_s17 = sphi %s668_s17, %s14_s17   ;;  %s632_s16 = sphi %s666_s16, %s735_s16   ;;  %s628_s15 = sphi %s664_s15, %s734_s15  }
   0x3   : > { %p35_p1 = scmp.ge.s32.totalorder %s33_s18, 2  ;;  %p225_p2 = scmp.lt.s32.totalorder %s636_s17, 3 }
   0x5   : > { %s737_s18 = smov (%p35_p1, %s33_s18), 0  ;;  %p226_p3 = pnand %p542_p0, %p225_p2 }
   0x6   : > { %p273_p4 = scmp.lt.s32.totalorder (!%p226_p3), %s628_s15, 1 }
   0x7   : > { %229 = sbr.rel (%p226_p3) target bundleno = 188 (0xbc), region = 36 }
   0xc   : > { %v587_v0 = vld [vmem:[%s730_s1 + $0x38] sm:$0xff]  ;;  %vm310_vm0 = vcmask 258048   ;;  %v586_v1 = vld [vmem:[%s730_s1 + $0x30] sm:$0xff]  ;;  %v638_v2 = vmov 0.0   ;;  %v585_v3 = vld [vmem:[%s730_s1 + $0x28] sm:$0xff]  ;;  %s739_s15 = smov (!%p273_p4, %s628_s15), 1 }
   0xd   : > { %378 = vmatpush.bf16.msra.mxu0 %v587_v0  ;;  %311 = vst.msk [vmem:[#allocation2] sm:$0x1f] %vm310_vm0, %v638_v2  ;;  %v584_v4 = vld [vmem:[%s730_s1 + $0x20] sm:$0xff]  ;;  %v583_v5 = vld [vmem:[%s730_s1 + $0x18] sm:$0xff]  ;;  %v582_v6 = vld [vmem:[%s730_s1 + $0x10] sm:$0xff]  ;;  %s543_s7 = sshll.u32 %s739_s15, 2 }
   0xe   : > { %v581_v7 = vld [vmem:[%s730_s1 + $0x8] sm:$0xff]  ;;  %v580_v8 = vld [vmem:[%s730_s1] sm:$0xff]  ;;  %s279_s12 = scalar_lea.vmem %s729_s0, %s543_s7  ;;  %s298_s19 = scalar_lea.vmem %s732_s3, %s543_s7  ;;  %vm407_vm1 = vcmask 256000   ;;  %vm408_vm2 = vsmask.f32 2304 }
   0xf   : > { %v313_v9 = vld [vmem:[%s279_s12] sm:$0x7]  ;;  %s305_s23 = scalar_lea.vmem %s733_s4, %s543_s7  ;;  %vm409_vm3 = vmand %vm407_vm1, %vm408_vm2 }
  0x10   : > { %v403_v13 = vld [vmem:[%s298_s19] sm:$0x7] }
  0x11   : > { %379 = vmatpush.bf16.msra.mxu0 %v586_v1  ;;  %v613_v14 = vld [vmem:[%s731_s2] ss:$0 sm:$0xff]  ;;  %v404_v16 = vunpack.c.l.bf16 %v403_v13 }
  0x12   : > { %v410_v20 = vld [vmem:[%s305_s23] sm:$0x7] }
  0x14   : > { %v312_v10 = vld [vmem:[#allocation2] sm:$0x1f] }
  0x15   : > { %380 = vmatpush.bf16.msra.mxu0 %v585_v3 }
  0x19   : > { %381 = vmatpush.bf16.msra.mxu0 %v584_v4 }
  0x1d   : > { %382 = vmatpush.bf16.msra.mxu0 %v583_v5 }
  0x21   : > { %383 = vmatpush.bf16.msra.mxu0 %v582_v6 }
  0x25   : > { %384 = vmatpush.bf16.msra.mxu0 %v581_v7 }
  0x29   : > { %385 = vmatpush.bf16.msra.mxu0 %v580_v8 }
  0x2c   : > { %386 = vmatmul.bf16.vlgmr.msra.gmra.mxu0 %v313_v9 }
  0xa9   : > { %v387_v11 = vpop.f32.mrf.mxu0 }
  0xaa   : > { %v391_v12 = vadd.f32 %v387_v11, %v312_v10 }
  0xac   : > { %393 = vst.msk [vmem:[#allocation2] sm:$0x1f] %vm310_vm0, %v391_v12 }
  0xb1   : > { %v389_v15 = vpop.f32.mrf.mxu0 }
  0xb3   : > { %v397_v17 = vld [vmem:[#allocation2] sm:$0x1f] }
  0xb4   : > { %v402_v18 = vadd.f32 %v613_v14, %v397_v17 }
  0xb6   : > { %v405_v19 = vadd.f32 %v404_v16, %v402_v18 }
  0xb8   : > { %v406_v21 = vpack.c.bf16 %v405_v19, %v405_v19 }
  0xba   : > { %v411_v22 = vsel %vm409_vm3, %v406_v21, %v410_v20 }
  0xbb   : > { %412 = vst [vmem:[%s305_s23] sm:$0x7] %v411_v22 }
  0xbc PF: > { %s14_s17 = sadd.s32 1, %s636_s17   ;;  %s734_s15 = smov %s632_s16 }
  0xbd   : > { %p11_p5 = scmp.ge.s32.totalorder %s14_s17, 4   ;;  %s735_s16 = smov %s737_s18 }
  0xbf   :  { %13 = sbr.rel (!%p11_p5) target bundleno = 2 (0x2), region = 83 }

// kernel: clip_model_super_forward.26
= control target key start
LH: loop header
LB: loop body
LE: loop exit
PB: predicated region body
PF: predicated region fallthrough
CT: control target
= control target key end

     0   :  { %s545_s18 = smov 0   ;;  %s547_s19 = smov 0   ;;  %s600_s0 = inlined_call_operand.vmem [shape: bf16[2,1,32], index: 0, kind: input, shape index: {}]   ;;  %s601_s1 = inlined_call_operand.vmem [shape: f32[1,32], index: 1, kind: input, shape index: {}]   ;;  %s602_s2 = inlined_call_operand.vmem [shape: f32[1,32], index: 2, kind: input, shape index: {}]   ;;  %s603_s3 = inlined_call_operand.vmem [shape: bf16[32,16], index: 3, kind: input, shape index: {}]   ;;  %s604_s4 = inlined_call_operand.vmem [shape: f32[1,16], index: 4, kind: input, shape index: {}]   ;;  %s605_s5 = inlined_call_operand.vmem [shape: f32[2,1,16], index: 5, kind: output, shape index: {}]  }
   0x1   :  { %s549_s20 = smov 0  }
   0x2 LB: > { %s27_s21 = sadd.s32 1, %s508_s19  ;;  %p447_p0 = scmp.ge.s32.totalorder %s512_s20, 1  ;;  %s512_s20 = sphi %s549_s20, %s15_s20   ;;  %s508_s19 = sphi %s547_s19, %s607_s19   ;;  %s504_s18 = sphi %s545_s18, %s606_s18  }
   0x3   : > { %p29_p1 = scmp.ge.s32.totalorder %s27_s21, 2  ;;  %p216_p2 = scmp.lt.s32.totalorder %s512_s20, 3 }
   0x5   : > { %s609_s21 = smov (%p29_p1, %s27_s21), 0  ;;  %p217_p3 = pnand %p447_p0, %p216_p2 }
   0x6   : > { %p250_p4 = scmp.lt.s32.totalorder (!%p217_p3), %s504_s18, 1 }
   0x7   : > { %220 = sbr.rel (%p217_p3) target bundleno = 430 (0x1ae), region = 40 }
   0xc   : > { %s611_s18 = smov (!%p250_p4, %s504_s18), 1  ;;  %vm273_vm0 = vcmask 253952   ;;  %v514_v3 = vmov 32.0   ;;  %v460_v15 = vld [vmem:[%s603_s3 + $0x8] sm:$0xff]  ;;  %v459_v18 = vld [vmem:[%s603_s3] sm:$0xff]  ;;  %vm332_vm7 = vcmask 261120  }
   0xd   : > { %s252_s24 = scalar_lea.vmem %s600_s0, %s611_s18  ;;  %486 = vrcp.f32 %v514_v3  ;;  %342 = vmatpush.bf16.msra.mxu0 %v460_v15  ;;  %v303_v26 = vld [vmem:[%s601_s1] sm:$0x1]  ;;  %vm309_vm5 = vsmask.f32 256  ;;  %s265_s12 = scalar_lea.vmem %s605_s5, %s611_s18  ;;  %vm349_vm8 = vcmask 122880  }
   0xe   : > { %v271_v0 = vld [vmem:[%s252_s24] sm:$0x1]  ;;  %vm310_vm6 = vmand %vm273_vm0, %vm309_vm5 }
   0xf   : > { %v272_v1 = vunpack.c.l.bf16 %v271_v0  ;;  %v305_v29 = vld [vmem:[%s602_s2] sm:$0x1] }
  0x10   : > { %v311_v32 = vld [vmem:[#allocation2] sm:$0x1] }
  0x11   : > { %v274_v2 = vsel %vm273_vm0, %v272_v1, 0.0  ;;  %343 = vmatpush.bf16.msra.mxu0 %v459_v18  ;;  %v319_v36 = vld [vmem:[%s604_s4] sm:$0x1] }
  0x12   : > { %275 = vadd.xlane.f32.xlu0 %v274_v2 }
  0x13   : > { %v487_v4 = vpop.eup %486 }
  0x14   : > { %v278_v5 = vmul.f32 32.0, %v487_v4  ;;  %vm282_vm1 = vweird.f32 %v487_v4 }
  0x16   : > { %v279_v6 = vsub.f32 1.0, %v278_v5 }
  0x18   : > { %v280_v7 = vmul.f32 %v487_v4, %v279_v6 }
  0x1a   : > { %v281_v8 = vadd.f32 %v487_v4, %v280_v7 }
  0x1c   : > { %v283_v9 = vsel %vm282_vm1, %v487_v4, %v281_v8 }
  0x85   : > { %v276_v10 = vpop.xlane.xlu0 %275 }
  0x86   : > { %v284_v11 = vmul.f32 %v283_v9, %v276_v10 }
  0x88   : > { %v285_v12 = vsub.f32 %v272_v1, %v284_v11 }
  0x8a   : > { %v286_v13 = vmul.f32 %v285_v12, %v285_v12 }
  0x8c   : > { %v287_v14 = vsel %vm273_vm0, %v286_v13, 0.0 }
  0x8d   : > { %288 = vadd.xlane.f32.xlu0 %v287_v14 }
 0x100   : > { %v289_v16 = vpop.xlane.xlu0 %288 }
 0x101   : > { %v290_v17 = vmul.f32 %v289_v16, %v283_v9 }
 0x103   : > { %v291_v19 = vadd.f32 1e-05, %v290_v17 }
 0x105   : > { %488 = vrsqrt.f32 %v291_v19  ;;  %vm298_vm3 = vweird.f32 %v291_v19 }
 0x10b   : > { %v489_v20 = vpop.eup %488 }
 0x10c   : > { %v293_v21 = vmul.f32 %v489_v20, %v291_v19  ;;  %vm299_vm2 = vweird.f32 %v489_v20 }
 0x10d   : > { %vm300_vm4 = vmor %vm298_vm3, %vm299_vm2 }
 0x10e   : > { %v294_v22 = vmul.f32 %v489_v20, %v293_v21 }
 0x110   : > { %v295_v23 = vmul.f32 0.5, %v294_v22 }
 0x112   : > { %v296_v24 = vsub.f32 1.5, %v295_v23 }
 0x114   : > { %v297_v25 = vmul.f32 %v489_v20, %v296_v24 }
 0x116   : > { %v301_v27 = vsel %vm300_vm4, %v489_v20, %v297_v25 }
 0x117   : > { %v302_v28 = vmul.f32 %v301_v27, %v285_v12 }
 0x119   : > { %v304_v30 = vmul.f32 %v303_v26, %v302_v28 }
 0x11b   : > { %v306_v31 = vadd.f32 %v305_v29, %v304_v30 }
 0x11d   : > { %v307_v33 = vpack.c.bf16 %v306_v31, %v306_v31 }
 0x11f   : > { %v312_v34 = vsel %vm310_vm6, %v307_v33, %v311_v32 }
 0x120   : > { %313 = vst [vmem:[#allocation2] sm:$0x1] %v312_v34 }
 0x127   : > { %v314_v35 = vld [vmem:[#allocation2] sm:$0x1] }
 0x128   : > { %456 = vmatmul.msk.bf16.vlgmr.msra.gmra.mxu0 %vm332_vm7, %v314_v35 }
 0x1a5   : > { %v345_v37 = vpop.f32.mrf.mxu0 }
 0x1a6   : > { %v346_v38 = vadd.f32 %v345_v37, %v319_v36 }
 0x1a8   : > { %350 = vst.msk [vmem:[%s265_s12] sm:$0x1] %vm349_vm8, %v346_v38 }
 0x1ad   : > { %v347_v39 = vpop.f32.mrf.mxu0 }
 0x1ae PF: > { %s15_s20 = sadd.s32 1, %s512_s20   ;;  %s606_s18 = smov %s508_s19 }
 0x1af   : > { %p12_p5 = scmp.ge.s32.totalorder %s15_s20, 4   ;;  %s607_s19 = smov %s609_s21 }
 0x1b1   :  { %14 = sbr.rel (!%p12_p5) target bundleno = 2 (0x2), region = 80 }

// kernel: clip_model_super_forward.27
= control target key start
LH: loop header
LB: loop body
LE: loop exit
PB: predicated region body
PF: predicated region fallthrough
CT: control target
= control target key end

     0   :  { %vm15_vm0 = vcmask 123904   ;;  %s134_s0 = inlined_call_operand.vmem [shape: f32[2,16], index: 0, kind: input, shape index: {}]   ;;  %s135_s1 = inlined_call_operand.vmem [shape: bf16[16,8], index: 1, kind: input, shape index: {}]   ;;  %s136_s2 = inlined_call_operand.hbm [shape: f32[2,8], index: 2, kind: output, shape index: {}]  }
   0x1   :  { %v13_v0 = vld [vmem:[%s134_s0] sm:$0x3] }
   0x2   :  { %7 = vsyncpa [#allocation3], 0  ;;  %v14_v1 = vmul.f32 %v13_v0, %v13_v0  ;;  %v79_v3 = vld [vmem:[%s135_s1] sm:$0xff]  ;;  %vm39_vm4 = vcmask 130048   ;;  %s109_s0 = smov [#allocation2]   ;;  %s65_s15 = sshll.u32 %s136_s2, 4  ;;  %s66_s15 = int_to_ptr.hbm [resolvable:$true] %s65_s15 }
   0x3   :  { %50 = vmatpush.bf16.msra.mxu0 %v79_v3  ;;  %s63_s13 = sshll.u32 %s109_s0, 4  ;;  %vm56_vm5 = vcmask 58368   ;;  %s64_s13 = int_to_ptr.vmem [resolvable:$true] %s63_s13 }
   0x4   :  { %v16_v2 = vsel %vm15_vm0, %v14_v1, 0.0 }
   0x5   :  { %17 = vadd.xlane.f32.xlu0 %v16_v2 }
  0x78   :  { %v18_v4 = vpop.xlane.xlu0 %17 }
  0x79   :  { %81 = vrsqrt.f32 %v18_v4  ;;  %vm25_vm2 = vweird.f32 %v18_v4 }
  0x7f   :  { %v82_v5 = vpop.eup %81 }
  0x80   :  { %v20_v6 = vmul.f32 %v82_v5, %v18_v4  ;;  %vm26_vm1 = vweird.f32 %v82_v5 }
  0x81   :  { %vm27_vm3 = vmor %vm25_vm2, %vm26_vm1 }
  0x82   :  { %v21_v7 = vmul.f32 %v82_v5, %v20_v6 }
  0x84   :  { %v22_v8 = vmul.f32 0.5, %v21_v7 }
  0x86   :  { %v23_v9 = vsub.f32 1.5, %v22_v8 }
  0x88   :  { %v24_v10 = vmul.f32 %v82_v5, %v23_v9 }
  0x8a   :  { %v28_v11 = vsel %vm27_vm3, %v82_v5, %v24_v10 }
  0x8b   :  { %v29_v12 = vmul.f32 %v28_v11, %v13_v0 }
  0x8d   :  { %v30_v13 = vpack.c.bf16 %v29_v12, %v29_v12 }
  0x8f   :  { %78 = vmatmul.msk.bf16.vlgmr.msra.gmra.mxu0 %vm39_vm4, %v30_v13 }
 0x10c   :  { %v52_v14 = vpop.f32.mrf.mxu0 }
 0x10d   :  { %57 = vst.msk [vmem:[#allocation2] sm:$0x3] %vm56_vm5, %v52_v14 }
 0x10e   :  { %68 = dma.vmem_to_hbm [thread:$0]  %s64_s13, 32, %s66_s15, [#allocation3]  }
 0x114   :  { %v54_v15 = vpop.f32.mrf.mxu0 }
 0x115   :  { %107 = dma.done.wait [#allocation3], 32  }
 0x116   :  { %108 = vsyncadd [#allocation3], 4294967264 }
 0x117   :  { %73 = vsyncpa [#allocation3], 1 }

</bundles_post_ra>
